<compile_context>
chip_gen: v6e
topology: v6e:2x2x1
jax: 0.10.0
libtpu: 0.0.40
codegen_flags: <defaults>
</compile_context>

<pallas_src>
import functools

import jax
import jax.numpy as jnp
from jax.experimental import pallas as pl
from jax.experimental.pallas import tpu as pltpu

DSP_SAMPLE_RATE = 24000
FRAME_LEN = 256          # synthetic STFT frame (real model: n_fft=2048, hop=512)
N_BINS = 128             # lane-aligned (real model: 1025 rfft bins)
EMBED_DIM = 128          # real model: 1024
HIDDEN_DIM = 64          # real model: 256
NUM_CONTROL_PARAMS = 24  # AutodiffChannel: 18 (parametric EQ) + 6 (compressor)
LEAKY_SLOPE = 0.02
LANE = 128               # lane-padded width for the narrow controller dims


def _leaky(h):
    return jnp.where(h > 0, h, LEAKY_SLOPE * h)


# ---------------------------------------------------------------------------
# Fused encoder(x) + encoder(y) + controller kernel, gridded over frame tiles
# ---------------------------------------------------------------------------
def _encode_control_kernel(xf_ref, yf_ref, dft_ref, w_proj_ref, b_proj_ref,
                           w1x_ref, w1y_ref, b1_ref, w2_ref, b2_ref,
                           w3_ref, b3_ref, w4_ref, b4_ref, w5_ref, b5_ref,
                           ex_ref, p_ref,
                           sum_x_ref, sq_x_ref, sum_y_ref, sq_y_ref,
                           *, bs, nf, tile_f):
    t = pl.program_id(0)

    @pl.when(t == 0)
    def _init():
        sum_x_ref[...] = jnp.zeros_like(sum_x_ref)
        sq_x_ref[...] = jnp.zeros_like(sq_x_ref)
        sum_y_ref[...] = jnp.zeros_like(sum_y_ref)
        sq_y_ref[...] = jnp.zeros_like(sq_y_ref)

    dft = dft_ref[...]                                    # (FRAME_LEN, 2*N_BINS) bf16

    def _accumulate(frames_ref, s_ref, q_ref):
        # Streamed spectral front-end: one (bs*tile_f, 256) x (256, 256) bf16 MXU matmul.
        frames = frames_ref[...].reshape(bs * tile_f, FRAME_LEN)
        spec = jnp.dot(frames.astype(jnp.bfloat16), dft,
                       preferred_element_type=jnp.float32)
        re = spec[:, :N_BINS]
        im = spec[:, N_BINS:]
        # |X|^0.3 == (re^2 + im^2 + eps)^0.15 -- elementwise/EUP math kept in f32.
        pwr = re * re + im * im + 1e-8
        xc = jnp.exp(0.15 * jnp.log(pwr))                 # (bs*tile_f, N_BINS)
        xc3 = xc.reshape(bs, tile_f, N_BINS)
        # Per-clip, per-bin running sums; standardization folded in at finalize.
        s_ref[...] += jnp.sum(xc3, axis=1)
        q_ref[...] += jnp.sum(xc3 * xc3, axis=1)

    _accumulate(xf_ref, sum_x_ref, sq_x_ref)
    _accumulate(yf_ref, sum_y_ref, sq_y_ref)

    @pl.when(t == pl.num_programs(0) - 1)
    def _finalize():
        n = float(nf * N_BINS)

        def _embed(s_ref, q_ref):
            s = s_ref[...]                                 # (bs, N_BINS)
            q = q_ref[...]
            tot = jnp.sum(s, axis=1, keepdims=True)        # (bs, 1)
            tot_sq = jnp.sum(q, axis=1, keepdims=True)
            mu = tot * (1.0 / n)
            var = jnp.maximum(tot_sq - n * mu * mu, 0.0) * (1.0 / (n - 1.0))
            # Standardization folded into the frame-mean pool (affine => exact).
            pooled = (s * (1.0 / nf) - mu) * jax.lax.rsqrt(var + 1e-8)
            # Linear projection (stand-in for CNN backbone) + guarded L2 norm.
            e = jnp.dot(pooled, w_proj_ref[...],
                        preferred_element_type=jnp.float32) + b_proj_ref[...]
            return e * jax.lax.rsqrt(
                jnp.sum(e * e, axis=-1, keepdims=True) + 1e-12)

        e_x = _embed(sum_x_ref, sq_x_ref)                  # (bs, EMBED_DIM)
        e_y = _embed(sum_y_ref, sq_y_ref)
        ex_ref[...] = e_x

        # StyleTransferController: h = e_x @ w1x + e_y @ w1y  (no lane concat,
        # no sub-8 sublane slices).
        h = _leaky(jnp.dot(e_x, w1x_ref[...], preferred_element_type=jnp.float32)
                   + jnp.dot(e_y, w1y_ref[...], preferred_element_type=jnp.float32)
                   + b1_ref[...])
        h = jnp.dot(h, w2_ref[...], preferred_element_type=jnp.float32) + b2_ref[...]
        h = _leaky(jnp.dot(h, w3_ref[...], preferred_element_type=jnp.float32)
                   + b3_ref[...])
        h = _leaky(jnp.dot(h, w4_ref[...], preferred_element_type=jnp.float32)
                   + b4_ref[...])
        h = jnp.dot(h, w5_ref[...], preferred_element_type=jnp.float32) + b5_ref[...]
        p_ref[...] = jax.nn.sigmoid(h)                     # (bs, LANE); sliced later


def _pick_frame_tile(nf, bs):
    """Largest 8-aligned frame tile dividing nf, <= ~8 MiB of double-buffered frames."""
    budget = 8 * 1024 * 1024
    for cand in (1024, 512, 256, 128, 64, 32, 16, 8):
        if nf % cand == 0 and 4 * bs * cand * FRAME_LEN * 4 <= budget:
            return cand
    return nf


def encode_and_control(params, x, y):
    """x, y: (batch, 1, samples) -> e_x: (batch, EMBED_DIM), p: (batch, P)."""
    bs, _, samples = x.shape
    nf = samples // FRAME_LEN
    tile_f = _pick_frame_tile(nf, bs)
    n_tiles = nf // tile_f

    def frame(a):
        # NOTE: the encoder analyzes the first nf*FRAME_LEN samples (STFT framing);
        # the processor still sees the full-length signal.
        return a[:, 0, : nf * FRAME_LEN].reshape(bs, nf, FRAME_LEN)

    w_names = ("dft", "w_proj", "b_proj", "w1x", "w1y", "b1",
               "w2", "b2", "w3", "b3", "w4", "b4", "w5", "b5")
    weights = [params[k] for k in w_names]

    def resident(arr):
        # Full-array block with constant index map: weights stay resident in VMEM.
        return pl.BlockSpec(arr.shape, lambda t, _nd=arr.ndim: (0,) * _nd)

    frame_spec = pl.BlockSpec((bs, tile_f, FRAME_LEN), lambda t: (0, t, 0))

    kernel = functools.partial(_encode_control_kernel, bs=bs, nf=nf, tile_f=tile_f)
    e_x, p_pad = pl.pallas_call(
        kernel,
        out_shape=(jax.ShapeDtypeStruct((bs, EMBED_DIM), jnp.float32),
                   jax.ShapeDtypeStruct((bs, LANE), jnp.float32)),
        grid=(n_tiles,),
        in_specs=[frame_spec, frame_spec] + [resident(w) for w in weights],
        out_specs=(pl.BlockSpec((bs, EMBED_DIM), lambda t: (0, 0)),
                   pl.BlockSpec((bs, LANE), lambda t: (0, 0))),
        scratch_shapes=[pltpu.VMEM((bs, N_BINS), jnp.float32)] * 4,
        compiler_params=pltpu.CompilerParams(
            dimension_semantics=("arbitrary",),            # frame axis is a reduction
            vmem_limit_bytes=32 * 1024 * 1024),            # budgeted for v7x's 64 MiB
        cost_estimate=pl.CostEstimate(
            flops=2 * (2 * bs * nf) * FRAME_LEN * (2 * N_BINS),
            transcendentals=2 * (2 * bs * nf) * N_BINS,
            bytes_accessed=2 * bs * nf * FRAME_LEN * 4),
    )(frame(x), frame(y), *weights)

    return e_x, p_pad[:, :NUM_CONTROL_PARAMS]


# ---------------------------------------------------------------------------
# Processor (AutodiffChannel) kernel -- simplified gain stage, large dense tiles
# ---------------------------------------------------------------------------
def _processor_kernel(gain_ref, x_ref, y_ref):
    # TODO(synk): AutodiffChannel's 6-band parametric EQ + compressor (frequency-
    # sampled IIR) chain is not reproduced in-kernel; only the appended gain applies.
    g = gain_ref[pl.program_id(0), 0]                      # per-clip gain from SMEM
    y_ref[...] = x_ref[...] * g


def _audio_layout(samples):
    """View one clip as (rows, cols) with cols a 128-multiple; pick a ~2 MiB row tile."""
    cols = 0
    for c in (1024, 512, 256, 128):
        if samples % c == 0:
            cols = c
            break
    if cols == 0:
        # TODO(synk): sample counts not divisible by 128 fall back to one wide row.
        return 1, samples, 1
    rows = samples // cols
    max_rows = max(8, (2 * 1024 * 1024) // (cols * 4))
    if rows <= max_rows:
        return rows, cols, rows
    best_any, best_aligned = 1, 0
    for r in range(1, max_rows + 1):
        if rows % r == 0:
            best_any = r
            if r % 8 == 0:
                best_aligned = r
    return rows, cols, (best_aligned if best_aligned else best_any)


def processor_forward(x, p_with_gain):
    bs, chs, samples = x.shape
    gain = p_with_gain[:, -1:]                             # (bs, 1) Cadenza-appended gain
    rows, cols, tile_r = _audio_layout(samples)
    x3 = x.reshape(bs, rows, cols)                         # chs == 1
    y3 = pl.pallas_call(
        _processor_kernel,
        out_shape=jax.ShapeDtypeStruct((bs, rows, cols), jnp.float32),
        grid=(bs, rows // tile_r),
        in_specs=[pl.BlockSpec(memory_space=pltpu.MemorySpace.SMEM),   # gain scalars
                  pl.BlockSpec((1, tile_r, cols), lambda b, t: (b, t, 0))],
        out_specs=pl.BlockSpec((1, tile_r, cols), lambda b, t: (b, t, 0)),
        compiler_params=pltpu.CompilerParams(
            dimension_semantics=("parallel", "parallel"),
            vmem_limit_bytes=32 * 1024 * 1024),
    )(gain, x3)
    return y3.reshape(bs, chs, samples)


# ---------------------------------------------------------------------------
# Parameter construction (deterministic, synthetic -- no checkpoint load)
# ---------------------------------------------------------------------------
def init_params(key):
    ks = jax.random.split(key, 8)

    def lin(k, fan_in, fan_out):
        w = jax.random.normal(k, (fan_in, fan_out), jnp.float32) / jnp.sqrt(float(fan_in))
        b = jnp.zeros((1, fan_out), jnp.float32)
        return w, b

    def pad2(a, rows, cols):
        return jnp.pad(a, ((0, rows - a.shape[0]), (0, cols - a.shape[1])))

    # Windowed DFT matrices (Hann folded in), fused [re | im] -> (L, 2K), stored bf16.
    l = jnp.arange(FRAME_LEN, dtype=jnp.float32)[:, None]
    kk = jnp.arange(N_BINS, dtype=jnp.float32)[None, :]
    ang = 2.0 * jnp.pi * l * kk / FRAME_LEN
    window = 0.5 - 0.5 * jnp.cos(
        2.0 * jnp.pi * jnp.arange(FRAME_LEN, dtype=jnp.float32) / FRAME_LEN)
    dft_re = window[:, None] * jnp.cos(ang)
    dft_im = -window[:, None] * jnp.sin(ang)
    dft = jnp.concatenate([dft_re, dft_im], axis=1).astype(jnp.bfloat16)  # (256, 256)

    w_proj, b_proj = lin(ks[0], N_BINS, EMBED_DIM)

    # Controller agg layer 1 kept as two separate halves (no lane concat in-kernel).
    w1x, _ = lin(ks[1], EMBED_DIM, EMBED_DIM)
    w1y, b1 = lin(ks[2], EMBED_DIM, EMBED_DIM)
    w2, b2 = lin(ks[3], EMBED_DIM, EMBED_DIM)

    # MLP layers, lane-padded to 128 so every store/matmul is lane-dense.
    # Padding columns of w5/b5 must stay exactly zero (p is sliced after sigmoid).
    w3, b3 = lin(ks[4], EMBED_DIM, HIDDEN_DIM)
    w4, b4 = lin(ks[5], HIDDEN_DIM, HIDDEN_DIM)
    w5, b5 = lin(ks[6], HIDDEN_DIM, NUM_CONTROL_PARAMS)

    return dict(dft=dft, w_proj=w_proj, b_proj=b_proj,
                w1x=w1x, w1y=w1y, b1=b1, w2=w2, b2=b2,
                w3=pad2(w3, EMBED_DIM, LANE), b3=pad2(b3, 1, LANE),
                w4=pad2(w4, LANE, LANE), b4=pad2(b4, 1, LANE),
                w5=pad2(w5, LANE, LANE), b5=pad2(b5, 1, LANE))


# ---------------------------------------------------------------------------
# CadenzaModel.forward
# ---------------------------------------------------------------------------
def cadenza_forward(params, x, y, gain, data_sample_rate=24000):
    # TODO(synk): torchaudio resample path (data_sample_rate != dsp_sample_rate)
    # not implemented; example uses matching sample rates as in the default call.
    assert data_sample_rate == DSP_SAMPLE_RATE
    e_x, p = encode_and_control(params, x, y)
    p_with_gain = jnp.concatenate([p, gain], axis=1)
    y_hat = processor_forward(x, p_with_gain)
    return y_hat, p_with_gain, e_x


if __name__ == "__main__":
    key = jax.random.PRNGKey(0)
    k_param, k_x, k_y, k_g = jax.random.split(key, 4)

    bs, chs, samples = 2, 1, 4096
    x = jax.random.normal(k_x, (bs, chs, samples), jnp.float32) * 0.1
    y = jax.random.normal(k_y, (bs, chs, samples), jnp.float32) * 0.1
    gain = jax.random.uniform(k_g, (bs, 1), jnp.float32, 0.5, 1.5)

    params = init_params(k_param)

    y_hat, p_with_gain, e_x = cadenza_forward(params, x, y, gain)
    jax.block_until_ready((y_hat, p_with_gain, e_x))

    assert y_hat.shape == (bs, chs, samples)
    assert p_with_gain.shape == (bs, NUM_CONTROL_PARAMS + 1)
    assert e_x.shape == (bs, EMBED_DIM)
    assert bool(jnp.all(jnp.isfinite(y_hat)))
    assert bool(jnp.all(jnp.isfinite(p_with_gain)))
    assert bool(jnp.all(jnp.isfinite(e_x)))
    print("KERNEL_OK")
</pallas_src>

<mosaic_0001>
module attributes {stable_mosaic.version = 11 : i64} {
  func.func @_encode_control_kernel(%arg0: i32, %arg1: memref<2x16x256xf32, #tpu.memory_space<vmem>>, %arg2: memref<2x16x256xf32, #tpu.memory_space<vmem>>, %arg3: memref<256x256xbf16, #tpu.memory_space<vmem>>, %arg4: memref<128x128xf32, #tpu.memory_space<vmem>>, %arg5: memref<1x128xf32, #tpu.memory_space<vmem>>, %arg6: memref<128x128xf32, #tpu.memory_space<vmem>>, %arg7: memref<128x128xf32, #tpu.memory_space<vmem>>, %arg8: memref<1x128xf32, #tpu.memory_space<vmem>>, %arg9: memref<128x128xf32, #tpu.memory_space<vmem>>, %arg10: memref<1x128xf32, #tpu.memory_space<vmem>>, %arg11: memref<128x128xf32, #tpu.memory_space<vmem>>, %arg12: memref<1x128xf32, #tpu.memory_space<vmem>>, %arg13: memref<128x128xf32, #tpu.memory_space<vmem>>, %arg14: memref<1x128xf32, #tpu.memory_space<vmem>>, %arg15: memref<128x128xf32, #tpu.memory_space<vmem>>, %arg16: memref<1x128xf32, #tpu.memory_space<vmem>>, %arg17: memref<2x128xf32, #tpu.memory_space<vmem>>, %arg18: memref<2x128xf32, #tpu.memory_space<vmem>>, %arg19: memref<2x128xf32, #tpu.memory_space<vmem>>, %arg20: memref<2x128xf32, #tpu.memory_space<vmem>>, %arg21: memref<2x128xf32, #tpu.memory_space<vmem>>, %arg22: memref<2x128xf32, #tpu.memory_space<vmem>>) attributes {dimension_semantics = [#tpu.dimension_semantics<arbitrary>], iteration_bounds = array<i64: 1>, scalar_prefetch = 0 : i64, scratch_operands = 4 : i64, tpu.core_type = #tpu.core_type<tc>, window_params = [{transform_indices = @transform_0, window_bounds = array<i64: 2, 16, 256>}, {transform_indices = @transform_1, window_bounds = array<i64: 2, 16, 256>}, {pipeline_mode = #tpu.pipeline_mode<synchronous>, transform_indices = @transform_2, window_bounds = array<i64: 256, 256>}, {pipeline_mode = #tpu.pipeline_mode<synchronous>, transform_indices = @transform_3, window_bounds = array<i64: 128, 128>}, {pipeline_mode = #tpu.pipeline_mode<synchronous>, transform_indices = @transform_4, window_bounds = array<i64: 1, 128>}, {pipeline_mode = #tpu.pipeline_mode<synchronous>, transform_indices = @transform_5, window_bounds = array<i64: 128, 128>}, {pipeline_mode = #tpu.pipeline_mode<synchronous>, transform_indices = @transform_6, window_bounds = array<i64: 128, 128>}, {pipeline_mode = #tpu.pipeline_mode<synchronous>, transform_indices = @transform_7, window_bounds = array<i64: 1, 128>}, {pipeline_mode = #tpu.pipeline_mode<synchronous>, transform_indices = @transform_8, window_bounds = array<i64: 128, 128>}, {pipeline_mode = #tpu.pipeline_mode<synchronous>, transform_indices = @transform_9, window_bounds = array<i64: 1, 128>}, {pipeline_mode = #tpu.pipeline_mode<synchronous>, transform_indices = @transform_10, window_bounds = array<i64: 128, 128>}, {pipeline_mode = #tpu.pipeline_mode<synchronous>, transform_indices = @transform_11, window_bounds = array<i64: 1, 128>}, {pipeline_mode = #tpu.pipeline_mode<synchronous>, transform_indices = @transform_12, window_bounds = array<i64: 128, 128>}, {pipeline_mode = #tpu.pipeline_mode<synchronous>, transform_indices = @transform_13, window_bounds = array<i64: 1, 128>}, {pipeline_mode = #tpu.pipeline_mode<synchronous>, transform_indices = @transform_14, window_bounds = array<i64: 128, 128>}, {pipeline_mode = #tpu.pipeline_mode<synchronous>, transform_indices = @transform_15, window_bounds = array<i64: 1, 128>}, {pipeline_mode = #tpu.pipeline_mode<synchronous>, transform_indices = @transform_16, window_bounds = array<i64: 2, 128>}, {pipeline_mode = #tpu.pipeline_mode<synchronous>, transform_indices = @transform_17, window_bounds = array<i64: 2, 128>}]} {
    %c0_i32 = arith.constant 0 : i32
    %0 = arith.cmpi eq, %arg0, %c0_i32 : i32
    %1 = arith.extui %0 : i1 to i32
    %c0_i32_0 = arith.constant 0 : i32
    %2 = arith.cmpi ne, %1, %c0_i32_0 : i32
    scf.if %2 {
      %cst_35 = arith.constant 0.000000e+00 : f32
      %57 = vector.broadcast %cst_35 : f32 to vector<2x128xf32>
      %c0_36 = arith.constant 0 : index
      %c0_37 = arith.constant 0 : index
      %58 = vector.load %arg19[%c0_36, %c0_37] : memref<2x128xf32, #tpu.memory_space<vmem>>, vector<2x128xf32>
      tpu.vector_store %arg19[%c0_36, %c0_37], %57 {strides = array<i32>} : memref<2x128xf32, #tpu.memory_space<vmem>>, vector<2x128xf32>,
      %cst_38 = arith.constant 0.000000e+00 : f32
      %59 = vector.broadcast %cst_38 : f32 to vector<2x128xf32>
      %c0_39 = arith.constant 0 : index
      %c0_40 = arith.constant 0 : index
      %60 = vector.load %arg20[%c0_39, %c0_40] : memref<2x128xf32, #tpu.memory_space<vmem>>, vector<2x128xf32>
      tpu.vector_store %arg20[%c0_39, %c0_40], %59 {strides = array<i32>} : memref<2x128xf32, #tpu.memory_space<vmem>>, vector<2x128xf32>,
      %cst_41 = arith.constant 0.000000e+00 : f32
      %61 = vector.broadcast %cst_41 : f32 to vector<2x128xf32>
      %c0_42 = arith.constant 0 : index
      %c0_43 = arith.constant 0 : index
      %62 = vector.load %arg21[%c0_42, %c0_43] : memref<2x128xf32, #tpu.memory_space<vmem>>, vector<2x128xf32>
      tpu.vector_store %arg21[%c0_42, %c0_43], %61 {strides = array<i32>} : memref<2x128xf32, #tpu.memory_space<vmem>>, vector<2x128xf32>,
      %cst_44 = arith.constant 0.000000e+00 : f32
      %63 = vector.broadcast %cst_44 : f32 to vector<2x128xf32>
      %c0_45 = arith.constant 0 : index
      %c0_46 = arith.constant 0 : index
      %64 = vector.load %arg22[%c0_45, %c0_46] : memref<2x128xf32, #tpu.memory_space<vmem>>, vector<2x128xf32>
      tpu.vector_store %arg22[%c0_45, %c0_46], %63 {strides = array<i32>} : memref<2x128xf32, #tpu.memory_space<vmem>>, vector<2x128xf32>,
    } else {
    }
    %c0 = arith.constant 0 : index
    %c0_1 = arith.constant 0 : index
    %3 = vector.load %arg3[%c0, %c0_1] : memref<256x256xbf16, #tpu.memory_space<vmem>>, vector<256x256xbf16>
    %c0_2 = arith.constant 0 : index
    %c0_3 = arith.constant 0 : index
    %c0_4 = arith.constant 0 : index
    %4 = vector.load %arg1[%c0_2, %c0_3, %c0_4] : memref<2x16x256xf32, #tpu.memory_space<vmem>>, vector<2x16x256xf32>
    %5 = vector.shape_cast %4 : vector<2x16x256xf32> to vector<32x256xf32>
    %6 = arith.truncf %5 : vector<32x256xf32> to vector<32x256xbf16>
    %cst = arith.constant dense<0.000000e+00> : vector<32x256xf32>
    %7 = tpu.matmul %6, %3, %cst {dimension_numbers = #tpu.dot_dimension_numbers<[1], [0], [0], [1], [0, 0, 1, 1], [], []>} : vector<32x256xbf16>, vector<256x256xbf16>, vector<32x256xf32> -> vector<32x256xf32>
    %8 = vector.extract_strided_slice %7 {offsets = [0, 0], sizes = [32, 128], strides = [1, 1]} : vector<32x256xf32> to vector<32x128xf32>
    %9 = vector.extract_strided_slice %7 {offsets = [0, 128], sizes = [32, 128], strides = [1, 1]} : vector<32x256xf32> to vector<32x128xf32>
    %10 = arith.mulf %8, %8 : vector<32x128xf32>
    %11 = arith.mulf %9, %9 : vector<32x128xf32>
    %12 = arith.addf %10, %11 : vector<32x128xf32>
    %cst_5 = arith.constant 9.99999993E-9 : f32
    %13 = vector.broadcast %cst_5 : f32 to vector<32x128xf32>
    %14 = arith.addf %12, %13 : vector<32x128xf32>
    %15 = math.log %14 : vector<32x128xf32>
    %cst_6 = arith.constant 1.500000e-01 : f32
    %16 = vector.broadcast %cst_6 : f32 to vector<32x128xf32>
    %17 = arith.mulf %16, %15 : vector<32x128xf32>
    %18 = math.exp %17 : vector<32x128xf32>
    %19 = vector.shape_cast %18 : vector<32x128xf32> to vector<2x16x128xf32>
    %c0_7 = arith.constant 0 : index
    %c0_8 = arith.constant 0 : index
    %20 = vector.load %arg19[%c0_7, %c0_8] : memref<2x128xf32, #tpu.memory_space<vmem>>, vector<2x128xf32>
    %cst_9 = arith.constant dense<0.000000e+00> : vector<2x128xf32>
    %21 = vector.multi_reduction <add>, %19, %cst_9 [1] : vector<2x16x128xf32> to vector<2x128xf32>
    %22 = arith.addf %20, %21 : vector<2x128xf32>
    %c0_10 = arith.constant 0 : index
    %c0_11 = arith.constant 0 : index
    %23 = vector.load %arg19[%c0_10, %c0_11] : memref<2x128xf32, #tpu.memory_space<vmem>>, vector<2x128xf32>
    tpu.vector_store %arg19[%c0_10, %c0_11], %22 {strides = array<i32>} : memref<2x128xf32, #tpu.memory_space<vmem>>, vector<2x128xf32>,
    %c0_12 = arith.constant 0 : index
    %c0_13 = arith.constant 0 : index
    %24 = vector.load %arg20[%c0_12, %c0_13] : memref<2x128xf32, #tpu.memory_space<vmem>>, vector<2x128xf32>
    %25 = arith.mulf %19, %19 : vector<2x16x128xf32>
    %cst_14 = arith.constant dense<0.000000e+00> : vector<2x128xf32>
    %26 = vector.multi_reduction <add>, %25, %cst_14 [1] : vector<2x16x128xf32> to vector<2x128xf32>
    %27 = arith.addf %24, %26 : vector<2x128xf32>
    %c0_15 = arith.constant 0 : index
    %c0_16 = arith.constant 0 : index
    %28 = vector.load %arg20[%c0_15, %c0_16] : memref<2x128xf32, #tpu.memory_space<vmem>>, vector<2x128xf32>
    tpu.vector_store %arg20[%c0_15, %c0_16], %27 {strides = array<i32>} : memref<2x128xf32, #tpu.memory_space<vmem>>, vector<2x128xf32>,
    %c0_17 = arith.constant 0 : index
    %c0_18 = arith.constant 0 : index
    %c0_19 = arith.constant 0 : index
    %29 = vector.load %arg2[%c0_17, %c0_18, %c0_19] : memref<2x16x256xf32, #tpu.memory_space<vmem>>, vector<2x16x256xf32>
    %30 = vector.shape_cast %29 : vector<2x16x256xf32> to vector<32x256xf32>
    %31 = arith.truncf %30 : vector<32x256xf32> to vector<32x256xbf16>
    %cst_20 = arith.constant dense<0.000000e+00> : vector<32x256xf32>
    %32 = tpu.matmul %31, %3, %cst_20 {dimension_numbers = #tpu.dot_dimension_numbers<[1], [0], [0], [1], [0, 0, 1, 1], [], []>} : vector<32x256xbf16>, vector<256x256xbf16>, vector<32x256xf32> -> vector<32x256xf32>
    %33 = vector.extract_strided_slice %32 {offsets = [0, 0], sizes = [32, 128], strides = [1, 1]} : vector<32x256xf32> to vector<32x128xf32>
    %34 = vector.extract_strided_slice %32 {offsets = [0, 128], sizes = [32, 128], strides = [1, 1]} : vector<32x256xf32> to vector<32x128xf32>
    %35 = arith.mulf %33, %33 : vector<32x128xf32>
    %36 = arith.mulf %34, %34 : vector<32x128xf32>
    %37 = arith.addf %35, %36 : vector<32x128xf32>
    %cst_21 = arith.constant 9.99999993E-9 : f32
    %38 = vector.broadcast %cst_21 : f32 to vector<32x128xf32>
    %39 = arith.addf %37, %38 : vector<32x128xf32>
    %40 = math.log %39 : vector<32x128xf32>
    %cst_22 = arith.constant 1.500000e-01 : f32
    %41 = vector.broadcast %cst_22 : f32 to vector<32x128xf32>
    %42 = arith.mulf %41, %40 : vector<32x128xf32>
    %43 = math.exp %42 : vector<32x128xf32>
    %44 = vector.shape_cast %43 : vector<32x128xf32> to vector<2x16x128xf32>
    %c0_23 = arith.constant 0 : index
    %c0_24 = arith.constant 0 : index
    %45 = vector.load %arg21[%c0_23, %c0_24] : memref<2x128xf32, #tpu.memory_space<vmem>>, vector<2x128xf32>
    %cst_25 = arith.constant dense<0.000000e+00> : vector<2x128xf32>
    %46 = vector.multi_reduction <add>, %44, %cst_25 [1] : vector<2x16x128xf32> to vector<2x128xf32>
    %47 = arith.addf %45, %46 : vector<2x128xf32>
    %c0_26 = arith.constant 0 : index
    %c0_27 = arith.constant 0 : index
    %48 = vector.load %arg21[%c0_26, %c0_27] : memref<2x128xf32, #tpu.memory_space<vmem>>, vector<2x128xf32>
    tpu.vector_store %arg21[%c0_26, %c0_27], %47 {strides = array<i32>} : memref<2x128xf32, #tpu.memory_space<vmem>>, vector<2x128xf32>,
    %c0_28 = arith.constant 0 : index
    %c0_29 = arith.constant 0 : index
    %49 = vector.load %arg22[%c0_28, %c0_29] : memref<2x128xf32, #tpu.memory_space<vmem>>, vector<2x128xf32>
    %50 = arith.mulf %44, %44 : vector<2x16x128xf32>
    %cst_30 = arith.constant dense<0.000000e+00> : vector<2x128xf32>
    %51 = vector.multi_reduction <add>, %50, %cst_30 [1] : vector<2x16x128xf32> to vector<2x128xf32>
    %52 = arith.addf %49, %51 : vector<2x128xf32>
    %c0_31 = arith.constant 0 : index
    %c0_32 = arith.constant 0 : index
    %53 = vector.load %arg22[%c0_31, %c0_32] : memref<2x128xf32, #tpu.memory_space<vmem>>, vector<2x128xf32>
    tpu.vector_store %arg22[%c0_31, %c0_32], %52 {strides = array<i32>} : memref<2x128xf32, #tpu.memory_space<vmem>>, vector<2x128xf32>,
    %c0_i32_33 = arith.constant 0 : i32
    %54 = arith.cmpi eq, %arg0, %c0_i32_33 : i32
    %55 = arith.extui %54 : i1 to i32
    %c0_i32_34 = arith.constant 0 : i32
    %56 = arith.cmpi ne, %55, %c0_i32_34 : i32
    scf.if %56 {
      %c0_35 = arith.constant 0 : index
      %c0_36 = arith.constant 0 : index
      %57 = vector.load %arg19[%c0_35, %c0_36] : memref<2x128xf32, #tpu.memory_space<vmem>>, vector<2x128xf32>
      %c0_37 = arith.constant 0 : index
      %c0_38 = arith.constant 0 : index
      %58 = vector.load %arg20[%c0_37, %c0_38] : memref<2x128xf32, #tpu.memory_space<vmem>>, vector<2x128xf32>
      %cst_39 = arith.constant dense<0.000000e+00> : vector<2xf32>
      %59 = vector.multi_reduction <add>, %57, %cst_39 [1] : vector<2x128xf32> to vector<2xf32>
      %60 = vector.shape_cast %59 : vector<2xf32> to vector<2x1xf32>
      %cst_40 = arith.constant dense<0.000000e+00> : vector<2xf32>
      %61 = vector.multi_reduction <add>, %58, %cst_40 [1] : vector<2x128xf32> to vector<2xf32>
      %62 = vector.shape_cast %61 : vector<2xf32> to vector<2x1xf32>
      %cst_41 = arith.constant 4.8828125E-4 : f32
      %63 = vector.broadcast %cst_41 : f32 to vector<2x1xf32>
      %64 = arith.mulf %60, %63 : vector<2x1xf32>
      %cst_42 = arith.constant 2.048000e+03 : f32
      %65 = vector.broadcast %cst_42 : f32 to vector<2x1xf32>
      %66 = arith.mulf %65, %64 : vector<2x1xf32>
      %67 = arith.mulf %66, %64 : vector<2x1xf32>
      %68 = arith.subf %62, %67 : vector<2x1xf32>
      %cst_43 = arith.constant 0.000000e+00 : f32
      %69 = vector.broadcast %cst_43 : f32 to vector<2x1xf32>
      %70 = arith.maximumf %68, %69 : vector<2x1xf32>
      %cst_44 = arith.constant 4.88519785E-4 : f32
      %71 = vector.broadcast %cst_44 : f32 to vector<2x1xf32>
      %72 = arith.mulf %70, %71 : vector<2x1xf32>
      %cst_45 = arith.constant 6.250000e-02 : f32
      %73 = vector.broadcast %cst_45 : f32 to vector<2x128xf32>
      %74 = arith.mulf %57, %73 : vector<2x128xf32>
      %75 = vector.broadcast %64 : vector<2x1xf32> to vector<2x128xf32>
      %76 = arith.subf %74, %75 : vector<2x128xf32>
      %cst_46 = arith.constant 9.99999993E-9 : f32
      %77 = vector.broadcast %cst_46 : f32 to vector<2x1xf32>
      %78 = arith.addf %72, %77 : vector<2x1xf32>
      %79 = math.rsqrt %78 : vector<2x1xf32>
      %80 = vector.broadcast %79 : vector<2x1xf32> to vector<2x128xf32>
      %81 = arith.mulf %76, %80 : vector<2x128xf32>
      %c0_47 = arith.constant 0 : index
      %c0_48 = arith.constant 0 : index
      %82 = vector.load %arg4[%c0_47, %c0_48] : memref<128x128xf32, #tpu.memory_space<vmem>>, vector<128x128xf32>
      %cst_49 = arith.constant dense<0.000000e+00> : vector<2x128xf32>
      %83 = tpu.matmul %81, %82, %cst_49 {dimension_numbers = #tpu.dot_dimension_numbers<[1], [0], [0], [1], [0, 0, 1, 1], [], []>} : vector<2x128xf32>, vector<128x128xf32>, vector<2x128xf32> -> vector<2x128xf32>
      %c0_50 = arith.constant 0 : index
      %c0_51 = arith.constant 0 : index
      %84 = vector.load %arg5[%c0_50, %c0_51] : memref<1x128xf32, #tpu.memory_space<vmem>>, vector<1x128xf32>
      %85 = vector.broadcast %84 : vector<1x128xf32> to vector<2x128xf32>
      %86 = arith.addf %83, %85 : vector<2x128xf32>
      %87 = arith.mulf %86, %86 : vector<2x128xf32>
      %cst_52 = arith.constant dense<0.000000e+00> : vector<2xf32>
      %88 = vector.multi_reduction <add>, %87, %cst_52 [1] : vector<2x128xf32> to vector<2xf32>
      %89 = vector.shape_cast %88 : vector<2xf32> to vector<2x1xf32>
      %cst_53 = arith.constant 9.99999996E-13 : f32
      %90 = vector.broadcast %cst_53 : f32 to vector<2x1xf32>
      %91 = arith.addf %89, %90 : vector<2x1xf32>
      %92 = math.rsqrt %91 : vector<2x1xf32>
      %93 = vector.broadcast %92 : vector<2x1xf32> to vector<2x128xf32>
      %94 = arith.mulf %86, %93 : vector<2x128xf32>
      %c0_54 = arith.constant 0 : index
      %c0_55 = arith.constant 0 : index
      %95 = vector.load %arg21[%c0_54, %c0_55] : memref<2x128xf32, #tpu.memory_space<vmem>>, vector<2x128xf32>
      %c0_56 = arith.constant 0 : index
      %c0_57 = arith.constant 0 : index
      %96 = vector.load %arg22[%c0_56, %c0_57] : memref<2x128xf32, #tpu.memory_space<vmem>>, vector<2x128xf32>
      %cst_58 = arith.constant dense<0.000000e+00> : vector<2xf32>
      %97 = vector.multi_reduction <add>, %95, %cst_58 [1] : vector<2x128xf32> to vector<2xf32>
      %98 = vector.shape_cast %97 : vector<2xf32> to vector<2x1xf32>
      %cst_59 = arith.constant dense<0.000000e+00> : vector<2xf32>
      %99 = vector.multi_reduction <add>, %96, %cst_59 [1] : vector<2x128xf32> to vector<2xf32>
      %100 = vector.shape_cast %99 : vector<2xf32> to vector<2x1xf32>
      %cst_60 = arith.constant 4.8828125E-4 : f32
      %101 = vector.broadcast %cst_60 : f32 to vector<2x1xf32>
      %102 = arith.mulf %98, %101 : vector<2x1xf32>
      %cst_61 = arith.constant 2.048000e+03 : f32
      %103 = vector.broadcast %cst_61 : f32 to vector<2x1xf32>
      %104 = arith.mulf %103, %102 : vector<2x1xf32>
      %105 = arith.mulf %104, %102 : vector<2x1xf32>
      %106 = arith.subf %100, %105 : vector<2x1xf32>
      %cst_62 = arith.constant 0.000000e+00 : f32
      %107 = vector.broadcast %cst_62 : f32 to vector<2x1xf32>
      %108 = arith.maximumf %106, %107 : vector<2x1xf32>
      %cst_63 = arith.constant 4.88519785E-4 : f32
      %109 = vector.broadcast %cst_63 : f32 to vector<2x1xf32>
      %110 = arith.mulf %108, %109 : vector<2x1xf32>
      %cst_64 = arith.constant 6.250000e-02 : f32
      %111 = vector.broadcast %cst_64 : f32 to vector<2x128xf32>
      %112 = arith.mulf %95, %111 : vector<2x128xf32>
      %113 = vector.broadcast %102 : vector<2x1xf32> to vector<2x128xf32>
      %114 = arith.subf %112, %113 : vector<2x128xf32>
      %cst_65 = arith.constant 9.99999993E-9 : f32
      %115 = vector.broadcast %cst_65 : f32 to vector<2x1xf32>
      %116 = arith.addf %110, %115 : vector<2x1xf32>
      %117 = math.rsqrt %116 : vector<2x1xf32>
      %118 = vector.broadcast %117 : vector<2x1xf32> to vector<2x128xf32>
      %119 = arith.mulf %114, %118 : vector<2x128xf32>
      %c0_66 = arith.constant 0 : index
      %c0_67 = arith.constant 0 : index
      %120 = vector.load %arg4[%c0_66, %c0_67] : memref<128x128xf32, #tpu.memory_space<vmem>>, vector<128x128xf32>
      %cst_68 = arith.constant dense<0.000000e+00> : vector<2x128xf32>
      %121 = tpu.matmul %119, %120, %cst_68 {dimension_numbers = #tpu.dot_dimension_numbers<[1], [0], [0], [1], [0, 0, 1, 1], [], []>} : vector<2x128xf32>, vector<128x128xf32>, vector<2x128xf32> -> vector<2x128xf32>
      %c0_69 = arith.constant 0 : index
      %c0_70 = arith.constant 0 : index
      %122 = vector.load %arg5[%c0_69, %c0_70] : memref<1x128xf32, #tpu.memory_space<vmem>>, vector<1x128xf32>
      %123 = vector.broadcast %122 : vector<1x128xf32> to vector<2x128xf32>
      %124 = arith.addf %121, %123 : vector<2x128xf32>
      %125 = arith.mulf %124, %124 : vector<2x128xf32>
      %cst_71 = arith.constant dense<0.000000e+00> : vector<2xf32>
      %126 = vector.multi_reduction <add>, %125, %cst_71 [1] : vector<2x128xf32> to vector<2xf32>
      %127 = vector.shape_cast %126 : vector<2xf32> to vector<2x1xf32>
      %cst_72 = arith.constant 9.99999996E-13 : f32
      %128 = vector.broadcast %cst_72 : f32 to vector<2x1xf32>
      %129 = arith.addf %127, %128 : vector<2x1xf32>
      %130 = math.rsqrt %129 : vector<2x1xf32>
      %131 = vector.broadcast %130 : vector<2x1xf32> to vector<2x128xf32>
      %132 = arith.mulf %124, %131 : vector<2x128xf32>
      %c0_73 = arith.constant 0 : index
      %c0_74 = arith.constant 0 : index
      %133 = vector.load %arg17[%c0_73, %c0_74] : memref<2x128xf32, #tpu.memory_space<vmem>>, vector<2x128xf32>
      tpu.vector_store %arg17[%c0_73, %c0_74], %94 {strides = array<i32>} : memref<2x128xf32, #tpu.memory_space<vmem>>, vector<2x128xf32>,
      %c0_75 = arith.constant 0 : index
      %c0_76 = arith.constant 0 : index
      %134 = vector.load %arg6[%c0_75, %c0_76] : memref<128x128xf32, #tpu.memory_space<vmem>>, vector<128x128xf32>
      %cst_77 = arith.constant dense<0.000000e+00> : vector<2x128xf32>
      %135 = tpu.matmul %94, %134, %cst_77 {dimension_numbers = #tpu.dot_dimension_numbers<[1], [0], [0], [1], [0, 0, 1, 1], [], []>} : vector<2x128xf32>, vector<128x128xf32>, vector<2x128xf32> -> vector<2x128xf32>
      %c0_78 = arith.constant 0 : index
      %c0_79 = arith.constant 0 : index
      %136 = vector.load %arg7[%c0_78, %c0_79] : memref<128x128xf32, #tpu.memory_space<vmem>>, vector<128x128xf32>
      %cst_80 = arith.constant dense<0.000000e+00> : vector<2x128xf32>
      %137 = tpu.matmul %132, %136, %cst_80 {dimension_numbers = #tpu.dot_dimension_numbers<[1], [0], [0], [1], [0, 0, 1, 1], [], []>} : vector<2x128xf32>, vector<128x128xf32>, vector<2x128xf32> -> vector<2x128xf32>
      %138 = arith.addf %135, %137 : vector<2x128xf32>
      %c0_81 = arith.constant 0 : index
      %c0_82 = arith.constant 0 : index
      %139 = vector.load %arg8[%c0_81, %c0_82] : memref<1x128xf32, #tpu.memory_space<vmem>>, vector<1x128xf32>
      %140 = vector.broadcast %139 : vector<1x128xf32> to vector<2x128xf32>
      %141 = arith.addf %138, %140 : vector<2x128xf32>
      %cst_83 = arith.constant 0.000000e+00 : f32
      %142 = vector.broadcast %cst_83 : f32 to vector<2x128xf32>
      %143 = arith.cmpf ogt, %141, %142 : vector<2x128xf32>
      %cst_84 = arith.constant 2.000000e-02 : f32
      %144 = vector.broadcast %cst_84 : f32 to vector<2x128xf32>
      %145 = arith.mulf %144, %141 : vector<2x128xf32>
      %146 = arith.select %143, %141, %145 : vector<2x128xi1>, vector<2x128xf32>
      %c0_85 = arith.constant 0 : index
      %c0_86 = arith.constant 0 : index
      %147 = vector.load %arg9[%c0_85, %c0_86] : memref<128x128xf32, #tpu.memory_space<vmem>>, vector<128x128xf32>
      %cst_87 = arith.constant dense<0.000000e+00> : vector<2x128xf32>
      %148 = tpu.matmul %146, %147, %cst_87 {dimension_numbers = #tpu.dot_dimension_numbers<[1], [0], [0], [1], [0, 0, 1, 1], [], []>} : vector<2x128xf32>, vector<128x128xf32>, vector<2x128xf32> -> vector<2x128xf32>
      %c0_88 = arith.constant 0 : index
      %c0_89 = arith.constant 0 : index
      %149 = vector.load %arg10[%c0_88, %c0_89] : memref<1x128xf32, #tpu.memory_space<vmem>>, vector<1x128xf32>
      %150 = vector.broadcast %149 : vector<1x128xf32> to vector<2x128xf32>
      %151 = arith.addf %148, %150 : vector<2x128xf32>
      %c0_90 = arith.constant 0 : index
      %c0_91 = arith.constant 0 : index
      %152 = vector.load %arg11[%c0_90, %c0_91] : memref<128x128xf32, #tpu.memory_space<vmem>>, vector<128x128xf32>
      %cst_92 = arith.constant dense<0.000000e+00> : vector<2x128xf32>
      %153 = tpu.matmul %151, %152, %cst_92 {dimension_numbers = #tpu.dot_dimension_numbers<[1], [0], [0], [1], [0, 0, 1, 1], [], []>} : vector<2x128xf32>, vector<128x128xf32>, vector<2x128xf32> -> vector<2x128xf32>
      %c0_93 = arith.constant 0 : index
      %c0_94 = arith.constant 0 : index
      %154 = vector.load %arg12[%c0_93, %c0_94] : memref<1x128xf32, #tpu.memory_space<vmem>>, vector<1x128xf32>
      %155 = vector.broadcast %154 : vector<1x128xf32> to vector<2x128xf32>
      %156 = arith.addf %153, %155 : vector<2x128xf32>
      %cst_95 = arith.constant 0.000000e+00 : f32
      %157 = vector.broadcast %cst_95 : f32 to vector<2x128xf32>
      %158 = arith.cmpf ogt, %156, %157 : vector<2x128xf32>
      %cst_96 = arith.constant 2.000000e-02 : f32
      %159 = vector.broadcast %cst_96 : f32 to vector<2x128xf32>
      %160 = arith.mulf %159, %156 : vector<2x128xf32>
      %161 = arith.select %158, %156, %160 : vector<2x128xi1>, vector<2x128xf32>
      %c0_97 = arith.constant 0 : index
      %c0_98 = arith.constant 0 : index
      %162 = vector.load %arg13[%c0_97, %c0_98] : memref<128x128xf32, #tpu.memory_space<vmem>>, vector<128x128xf32>
      %cst_99 = arith.constant dense<0.000000e+00> : vector<2x128xf32>
      %163 = tpu.matmul %161, %162, %cst_99 {dimension_numbers = #tpu.dot_dimension_numbers<[1], [0], [0], [1], [0, 0, 1, 1], [], []>} : vector<2x128xf32>, vector<128x128xf32>, vector<2x128xf32> -> vector<2x128xf32>
      %c0_100 = arith.constant 0 : index
      %c0_101 = arith.constant 0 : index
      %164 = vector.load %arg14[%c0_100, %c0_101] : memref<1x128xf32, #tpu.memory_space<vmem>>, vector<1x128xf32>
      %165 = vector.broadcast %164 : vector<1x128xf32> to vector<2x128xf32>
      %166 = arith.addf %163, %165 : vector<2x128xf32>
      %cst_102 = arith.constant 0.000000e+00 : f32
      %167 = vector.broadcast %cst_102 : f32 to vector<2x128xf32>
      %168 = arith.cmpf ogt, %166, %167 : vector<2x128xf32>
      %cst_103 = arith.constant 2.000000e-02 : f32
      %169 = vector.broadcast %cst_103 : f32 to vector<2x128xf32>
      %170 = arith.mulf %169, %166 : vector<2x128xf32>
      %171 = arith.select %168, %166, %170 : vector<2x128xi1>, vector<2x128xf32>
      %c0_104 = arith.constant 0 : index
      %c0_105 = arith.constant 0 : index
      %172 = vector.load %arg15[%c0_104, %c0_105] : memref<128x128xf32, #tpu.memory_space<vmem>>, vector<128x128xf32>
      %cst_106 = arith.constant dense<0.000000e+00> : vector<2x128xf32>
      %173 = tpu.matmul %171, %172, %cst_106 {dimension_numbers = #tpu.dot_dimension_numbers<[1], [0], [0], [1], [0, 0, 1, 1], [], []>} : vector<2x128xf32>, vector<128x128xf32>, vector<2x128xf32> -> vector<2x128xf32>
      %c0_107 = arith.constant 0 : index
      %c0_108 = arith.constant 0 : index
      %174 = vector.load %arg16[%c0_107, %c0_108] : memref<1x128xf32, #tpu.memory_space<vmem>>, vector<1x128xf32>
      %175 = vector.broadcast %174 : vector<1x128xf32> to vector<2x128xf32>
      %176 = arith.addf %173, %175 : vector<2x128xf32>
      %177 = arith.negf %176 : vector<2x128xf32>
      %178 = math.exp %177 : vector<2x128xf32>
      %cst_109 = arith.constant 1.000000e+00 : f32
      %179 = vector.broadcast %cst_109 : f32 to vector<2x128xf32>
      %180 = arith.addf %179, %178 : vector<2x128xf32>
      %181 = arith.divf %179, %180 : vector<2x128xf32>
      %c0_110 = arith.constant 0 : index
      %c0_111 = arith.constant 0 : index
      %182 = vector.load %arg18[%c0_110, %c0_111] : memref<2x128xf32, #tpu.memory_space<vmem>>, vector<2x128xf32>
      tpu.vector_store %arg18[%c0_110, %c0_111], %181 {strides = array<i32>} : memref<2x128xf32, #tpu.memory_space<vmem>>, vector<2x128xf32>,
    } else {
    }
    return
  }
  func.func @transform_0(%arg0: i32) -> (i32, i32, i32) {
    %c0_i32 = arith.constant 0 : i32
    %c0_i32_0 = arith.constant 0 : i32
    %c0_i32_1 = arith.constant 0 : i32
    return %c0_i32, %arg0, %c0_i32_0 : i32, i32, i32
  }
  func.func @transform_1(%arg0: i32) -> (i32, i32, i32) {
    %c0_i32 = arith.constant 0 : i32
    %c0_i32_0 = arith.constant 0 : i32
    %c0_i32_1 = arith.constant 0 : i32
    return %c0_i32, %arg0, %c0_i32_0 : i32, i32, i32
  }
  func.func @transform_2(%arg0: i32) -> (i32, i32) {
    %c0_i32 = arith.constant 0 : i32
    %c0_i32_0 = arith.constant 0 : i32
    %c0_i32_1 = arith.constant 0 : i32
    return %c0_i32, %c0_i32_0 : i32, i32
  }
  func.func @transform_3(%arg0: i32) -> (i32, i32) {
    %c0_i32 = arith.constant 0 : i32
    %c0_i32_0 = arith.constant 0 : i32
    %c0_i32_1 = arith.constant 0 : i32
    return %c0_i32, %c0_i32_0 : i32, i32
  }
  func.func @transform_4(%arg0: i32) -> (i32, i32) {
    %c0_i32 = arith.constant 0 : i32
    %c0_i32_0 = arith.constant 0 : i32
    %c0_i32_1 = arith.constant 0 : i32
    return %c0_i32, %c0_i32_0 : i32, i32
  }
  func.func @transform_5(%arg0: i32) -> (i32, i32) {
    %c0_i32 = arith.constant 0 : i32
    %c0_i32_0 = arith.constant 0 : i32
    %c0_i32_1 = arith.constant 0 : i32
    return %c0_i32, %c0_i32_0 : i32, i32
  }
  func.func @transform_6(%arg0: i32) -> (i32, i32) {
    %c0_i32 = arith.constant 0 : i32
    %c0_i32_0 = arith.constant 0 : i32
    %c0_i32_1 = arith.constant 0 : i32
    return %c0_i32, %c0_i32_0 : i32, i32
  }
  func.func @transform_7(%arg0: i32) -> (i32, i32) {
    %c0_i32 = arith.constant 0 : i32
    %c0_i32_0 = arith.constant 0 : i32
    %c0_i32_1 = arith.constant 0 : i32
    return %c0_i32, %c0_i32_0 : i32, i32
  }
  func.func @transform_8(%arg0: i32) -> (i32, i32) {
    %c0_i32 = arith.constant 0 : i32
    %c0_i32_0 = arith.constant 0 : i32
    %c0_i32_1 = arith.constant 0 : i32
    return %c0_i32, %c0_i32_0 : i32, i32
  }
  func.func @transform_9(%arg0: i32) -> (i32, i32) {
    %c0_i32 = arith.constant 0 : i32
    %c0_i32_0 = arith.constant 0 : i32
    %c0_i32_1 = arith.constant 0 : i32
    return %c0_i32, %c0_i32_0 : i32, i32
  }
  func.func @transform_10(%arg0: i32) -> (i32, i32) {
    %c0_i32 = arith.constant 0 : i32
    %c0_i32_0 = arith.constant 0 : i32
    %c0_i32_1 = arith.constant 0 : i32
    return %c0_i32, %c0_i32_0 : i32, i32
  }
  func.func @transform_11(%arg0: i32) -> (i32, i32) {
    %c0_i32 = arith.constant 0 : i32
    %c0_i32_0 = arith.constant 0 : i32
    %c0_i32_1 = arith.constant 0 : i32
    return %c0_i32, %c0_i32_0 : i32, i32
  }
  func.func @transform_12(%arg0: i32) -> (i32, i32) {
    %c0_i32 = arith.constant 0 : i32
    %c0_i32_0 = arith.constant 0 : i32
    %c0_i32_1 = arith.constant 0 : i32
    return %c0_i32, %c0_i32_0 : i32, i32
  }
  func.func @transform_13(%arg0: i32) -> (i32, i32) {
    %c0_i32 = arith.constant 0 : i32
    %c0_i32_0 = arith.constant 0 : i32
    %c0_i32_1 = arith.constant 0 : i32
    return %c0_i32, %c0_i32_0 : i32, i32
  }
  func.func @transform_14(%arg0: i32) -> (i32, i32) {
    %c0_i32 = arith.constant 0 : i32
    %c0_i32_0 = arith.constant 0 : i32
    %c0_i32_1 = arith.constant 0 : i32
    return %c0_i32, %c0_i32_0 : i32, i32
  }
  func.func @transform_15(%arg0: i32) -> (i32, i32) {
    %c0_i32 = arith.constant 0 : i32
    %c0_i32_0 = arith.constant 0 : i32
    %c0_i32_1 = arith.constant 0 : i32
    return %c0_i32, %c0_i32_0 : i32, i32
  }
  func.func @transform_16(%arg0: i32) -> (i32, i32) {
    %c0_i32 = arith.constant 0 : i32
    %c0_i32_0 = arith.constant 0 : i32
    %c0_i32_1 = arith.constant 0 : i32
    return %c0_i32, %c0_i32_0 : i32, i32
  }
  func.func @transform_17(%arg0: i32) -> (i32, i32) {
    %c0_i32 = arith.constant 0 : i32
    %c0_i32_0 = arith.constant 0 : i32
    %c0_i32_1 = arith.constant 0 : i32
    return %c0_i32, %c0_i32_0 : i32, i32
  }
}

</mosaic_0001>

<bundles_post_ra>
// kernel: tpu_custom_call.1
= control target key start
LH: loop header
LB: loop body
LE: loop exit
PB: predicated region body
PF: predicated region fallthrough
CT: control target
= control target key end

     0   :  { %s2699_s0 = inlined_call_operand.hbm [shape: f32[2,16,256], index: 0, kind: input, shape index: {}]   ;;  %s2700_s1 = inlined_call_operand.hbm [shape: f32[2,16,256], index: 1, kind: input, shape index: {}]   ;;  %s2701_s2 = inlined_call_operand.hbm [shape: bf16[256,256], index: 2, kind: input, shape index: {}]   ;;  %s2702_s3 = inlined_call_operand.hbm [shape: f32[128,128], index: 3, kind: input, shape index: {}]   ;;  %s2703_s4 = inlined_call_operand.vmem [shape: f32[1,128], index: 4, kind: input, shape index: {}]   ;;  %s2704_s5 = inlined_call_operand.hbm [shape: f32[128,128], index: 5, kind: input, shape index: {}]   ;;  %s2705_s6 = inlined_call_operand.hbm [shape: f32[128,128], index: 6, kind: input, shape index: {}]   ;;  %s2706_s7 = inlined_call_operand.vmem [shape: f32[1,128], index: 7, kind: input, shape index: {}]   ;;  %s2707_s8 = inlined_call_operand.hbm [shape: f32[128,128], index: 8, kind: input, shape index: {}]   ;;  %s2708_s9 = inlined_call_operand.vmem [shape: f32[1,128], index: 9, kind: input, shape index: {}]   ;;  %s2709_s10 = inlined_call_operand.hbm [shape: f32[128,128], index: 10, kind: input, shape index: {}]   ;;  %s2710_s11 = inlined_call_operand.vmem [shape: f32[1,128], index: 11, kind: input, shape index: {}]   ;;  %s2711_s12 = inlined_call_operand.hbm [shape: f32[128,128], index: 12, kind: input, shape index: {}]   ;;  %s2712_s13 = inlined_call_operand.vmem [shape: f32[1,128], index: 13, kind: input, shape index: {}]   ;;  %s2713_s14 = inlined_call_operand.hbm [shape: f32[128,128], index: 14, kind: input, shape index: {}]   ;;  %s2714_s15 = inlined_call_operand.vmem [shape: f32[1,128], index: 15, kind: input, shape index: {}]   ;;  %s2715_s16 = inlined_call_operand.hbm [shape: f32[2,128], index: 16, kind: output, shape index: {0}]   ;;  %s2716_s17 = inlined_call_operand.hbm [shape: f32[2,128], index: 17, kind: output, shape index: {1}]  }
   0x1   :  { %2717 = sst [smem:[#allocation34_spill]] %s2699_s0 }
   0x2   :  { %2718 = sst [smem:[#allocation35_spill]] %s2700_s1 }
   0x3   :  { %23 = vsyncpa [#allocation7], 0 }
   0x4   :  { %24 = vsyncpa [#allocation10], 0 }
   0x5   :  { %25 = vsyncpa [#allocation13], 0 }
   0x6   :  { %26 = vsyncpa [#allocation16], 0 }
   0x7   :  { %27 = vsyncpa [#allocation19], 0 }
   0x8   :  { %28 = vsyncpa [#allocation22], 0 }
   0x9   :  { %29 = vsyncpa [#allocation8], 0 }
   0xa   :  { %30 = vsyncpa [#allocation25], 0  ;;  %s2331_s24 = smov [#allocation9]  }
   0xb   :  { %s48_s25 = sshll.u32 %s2331_s24, 4  ;;  %s49_s25 = int_to_ptr.vmem [resolvable:$true] %s48_s25 }
   0xc   :  { %s2083_s26 = scalar_lea.vmem %s49_s25, 1024  ;;  %p2088_p1 = scmp.lt.s32.totalorder %s49_s25, %s49_s25 }
   0xd   :  { %p2084_p0 = scmp.ne.s32.totalorder %s49_s25, %s2083_s26  ;;  %p2089_p2 = scmp.lt.s32.totalorder %s2083_s26, %s2083_s26 }
   0xf   :  { %p2090_p3 = por %p2089_p2, %p2088_p1 }
  0x11   :  { %p2091_p4 = pnand %p2090_p3, %p2084_p0 }
  0x13   :  { %2094 = shalt.err (!%p2091_p4)
}
  0x14   :  { %s2332_s27 = smov 256   ;;  %s2333_s28 = smov 16  }
  0x15   :  { %s2719_s30 = sld [smem:[#allocation35_spill]]  ;;  %s2334_s18 = smov [#allocation12]  }
  0x16   :  { %s72_s19 = sshll.u32 %s2334_s18, 4  ;;  %s2335_s1 = smov [#allocation15]   ;;  %s73_s19 = int_to_ptr.vmem [resolvable:$true] %s72_s19 }
  0x17   :  { %s98_s20 = sshll.u32 %s2335_s1, 4  ;;  %s2103_s21 = scalar_lea.vmem %s73_s19, 2048  ;;  %s99_s20 = int_to_ptr.vmem [resolvable:$true] %s98_s20 }
  0x18   :  { %p2104_p5 = scmp.ne.s32.totalorder %s73_s19, %s2103_s21  ;;  %p2108_p6 = scmp.lt.s32.totalorder %s73_s19, %s73_s19 }
  0x19   :  { %p2109_p7 = scmp.lt.s32.totalorder %s2103_s21, %s2103_s21 }
  0x1b   :  { %54 = dma.hbm_to_vmem [thread:$0]  %s2719_s30, 1024, %s49_s25, [#allocation10], %s2332_s27, %s2332_s27, %s2333_s28  }
  0x1c   :  { %p2110_p8 = por %p2109_p7, %p2108_p6 }
  0x1e   :  { %p2111_p9 = pnand %p2110_p8, %p2104_p5 }
  0x20   :  { %2114 = shalt.err (!%p2111_p9)
}
  0x21   :  { %s2336_s22 = smov 128   ;;  %s2337_s23 = smov 8  }
  0x22   :  { %78 = dma.hbm_to_vmem [thread:$0]  %s2702_s3, 2048, %s73_s19, [#allocation13], %s2336_s22, %s2336_s22, %s2337_s23  }
  0x23   :  { %s2123_s25 = scalar_lea.vmem %s99_s20, 2048  ;;  %p2128_p11 = scmp.lt.s32.totalorder %s99_s20, %s99_s20 }
  0x24   :  { %p2124_p10 = scmp.ne.s32.totalorder %s99_s20, %s2123_s25  ;;  %p2129_p12 = scmp.lt.s32.totalorder %s2123_s25, %s2123_s25 }
  0x26   :  { %p2130_p13 = por %p2129_p12, %p2128_p11 }
  0x28   :  { %p2131_p0 = pnand %p2130_p13, %p2124_p10 }
  0x2a   :  { %2134 = shalt.err (!%p2131_p0)
}
  0x2b   :  { %104 = dma.hbm_to_vmem [thread:$0]  %s2705_s6, 2048, %s99_s20, [#allocation16], %s2336_s22, %s2336_s22, %s2337_s23  }
  0x2c   :  { %s2338_s30 = smov [#allocation18]   ;;  %s2339_s1 = smov [#allocation6]  }
  0x2d   :  { %s126_s18 = sshll.u32 %s2338_s30, 4  ;;  %s36_s3 = sshll.u32 %s2339_s1, 4  ;;  %s127_s18 = int_to_ptr.vmem [resolvable:$true] %s126_s18  ;;  %s37_s3 = int_to_ptr.vmem [resolvable:$true] %s36_s3 }
  0x2e   :  { %s2143_s19 = scalar_lea.vmem %s127_s18, 2048  ;;  %p2148_p2 = scmp.lt.s32.totalorder %s127_s18, %s127_s18 }
  0x2f   :  { %p2144_p1 = scmp.ne.s32.totalorder %s127_s18, %s2143_s19  ;;  %p2149_p3 = scmp.lt.s32.totalorder %s2143_s19, %s2143_s19 }
  0x31   :  { %p2150_p4 = por %p2149_p3, %p2148_p2 }
  0x33   :  { %p2151_p5 = pnand %p2150_p4, %p2144_p1 }
  0x35   :  { %2154 = shalt.err (!%p2151_p5)
}
  0x36   :  { %132 = dma.hbm_to_vmem [thread:$0]  %s2709_s10, 2048, %s127_s18, [#allocation19], %s2336_s22, %s2336_s22, %s2337_s23  }
  0x37   :  { %s2163_s6 = scalar_lea.vmem %s37_s3, 1024  ;;  %p2168_p7 = scmp.lt.s32.totalorder %s37_s3, %s37_s3 }
  0x38   :  { %p2164_p6 = scmp.ne.s32.totalorder %s37_s3, %s2163_s6  ;;  %p2169_p8 = scmp.lt.s32.totalorder %s2163_s6, %s2163_s6 }
  0x3a   :  { %p2170_p9 = por %p2169_p8, %p2168_p7 }
  0x3c   :  { %p2171_p10 = pnand %p2170_p9, %p2164_p6 }
  0x3e   :  { %2174 = shalt.err (!%p2171_p10)
}
  0x3f   :  { %s2720_s25 = sld [smem:[#allocation34_spill]]  ;;  %s2340_s29 = smov [#allocation11]  }
  0x40   :  { %s60_s0 = sshll.u32 %s2340_s29, 4  ;;  %s2341_s30 = smov [#allocation14]   ;;  %s61_s0 = int_to_ptr.vmem [resolvable:$true] %s60_s0 }
  0x41   :  { %s86_s10 = sshll.u32 %s2341_s30, 4  ;;  %s2183_s18 = scalar_lea.vmem %s61_s0, 4096  ;;  %s87_s10 = int_to_ptr.vmem [resolvable:$true] %s86_s10 }
  0x42   :  { %p2184_p11 = scmp.ne.s32.totalorder %s61_s0, %s2183_s18  ;;  %p2188_p12 = scmp.lt.s32.totalorder %s61_s0, %s61_s0 }
  0x43   :  { %p2189_p13 = scmp.lt.s32.totalorder %s2183_s18, %s2183_s18 }
  0x45   :  { %42 = dma.hbm_to_vmem [thread:$0]  %s2720_s25, 1024, %s37_s3, [#allocation7], %s2332_s27, %s2332_s27, %s2333_s28  }
  0x46   :  { %p2190_p0 = por %p2189_p13, %p2188_p12 }
  0x48   :  { %p2191_p1 = pnand %p2190_p0, %p2184_p11 }
  0x4a   :  { %2194 = shalt.err (!%p2191_p1)
}
  0x4b   :  { %66 = dma.hbm_to_vmem [thread:$0]  %s2701_s2, 4096, %s61_s0, [#allocation10], %s2336_s22, %s2336_s22, %s2337_s23  }
  0x4c   :  { %s2203_s27 = scalar_lea.vmem %s87_s10, 2048  ;;  %p2208_p3 = scmp.lt.s32.totalorder %s87_s10, %s87_s10 }
  0x4d   :  { %p2204_p2 = scmp.ne.s32.totalorder %s87_s10, %s2203_s27  ;;  %p2209_p4 = scmp.lt.s32.totalorder %s2203_s27, %s2203_s27 }
  0x4f   :  { %p2210_p5 = por %p2209_p4, %p2208_p3 }
  0x51   :  { %p2211_p6 = pnand %p2210_p5, %p2204_p2 }
  0x53   :  { %2214 = shalt.err (!%p2211_p6)
}
  0x54   :  { %92 = dma.hbm_to_vmem [thread:$0]  %s2704_s5, 2048, %s87_s10, [#allocation13], %s2336_s22, %s2336_s22, %s2337_s23  }
  0x55   :  { %s2342_s21 = smov [#allocation17]   ;;  %s2343_s6 = smov [#allocation20]  }
  0x56   :  { %s112_s24 = sshll.u32 %s2342_s21, 4  ;;  %s140_s2 = sshll.u32 %s2343_s6, 4  ;;  %s113_s24 = int_to_ptr.vmem [resolvable:$true] %s112_s24  ;;  %s141_s2 = int_to_ptr.vmem [resolvable:$true] %s140_s2 }
  0x57   :  { %s2223_s20 = scalar_lea.vmem %s113_s24, 2048  ;;  %p2228_p8 = scmp.lt.s32.totalorder %s113_s24, %s113_s24 }
  0x58   :  { %p2224_p7 = scmp.ne.s32.totalorder %s113_s24, %s2223_s20  ;;  %p2229_p9 = scmp.lt.s32.totalorder %s2223_s20, %s2223_s20 }
  0x5a   :  { %p2230_p10 = por %p2229_p9, %p2228_p8 }
  0x5c   :  { %p2231_p11 = pnand %p2230_p10, %p2224_p7 }
  0x5e   :  { %2234 = shalt.err (!%p2231_p11)
}
  0x5f   :  { %118 = dma.hbm_to_vmem [thread:$0]  %s2707_s8, 2048, %s113_s24, [#allocation16], %s2336_s22, %s2336_s22, %s2337_s23  }
  0x60   :  { %s2243_s5 = scalar_lea.vmem %s141_s2, 2048  ;;  %p2248_p13 = scmp.lt.s32.totalorder %s141_s2, %s141_s2 }
  0x61   :  { %p2244_p12 = scmp.ne.s32.totalorder %s141_s2, %s2243_s5  ;;  %p2249_p0 = scmp.lt.s32.totalorder %s2243_s5, %s2243_s5 }
  0x63   :  { %p2250_p1 = por %p2249_p0, %p2248_p13 }
  0x65   :  { %p2251_p2 = pnand %p2250_p1, %p2244_p12 }
  0x67   :  { %2254 = shalt.err (!%p2251_p2)
}
  0x68   :  { %146 = dma.hbm_to_vmem [thread:$0]  %s2711_s12, 2048, %s141_s2, [#allocation19], %s2336_s22, %s2336_s22, %s2337_s23  }
  0x69   :  { %s2344_s30 = smov [#allocation21]  }
  0x6a   :  { %s154_s10 = sshll.u32 %s2344_s30, 4  ;;  %s155_s10 = int_to_ptr.vmem [resolvable:$true] %s154_s10 }
  0x6b   :  { %s2263_s18 = scalar_lea.vmem %s155_s10, 2048  ;;  %p2268_p4 = scmp.lt.s32.totalorder %s155_s10, %s155_s10 }
  0x6c   :  { %p2264_p3 = scmp.ne.s32.totalorder %s155_s10, %s2263_s18  ;;  %p2269_p5 = scmp.lt.s32.totalorder %s2263_s18, %s2263_s18 }
  0x6e   :  { %p2270_p6 = por %p2269_p5, %p2268_p4 }
  0x70   :  { %p2271_p7 = pnand %p2270_p6, %p2264_p3 }
  0x72   :  { %2274 = shalt.err (!%p2271_p7)
}
  0x73   :  { %160 = dma.hbm_to_vmem [thread:$0]  %s2713_s14, 2048, %s155_s10, [#allocation22], %s2336_s22, %s2336_s22, %s2337_s23  }
  0x74   :  { %2315 = dma.done.wait [#allocation7], 1024  }
  0x75   :  { %2316 = vsyncadd [#allocation7], 4294966272 }
  0x76   :  { %2317 = dma.done.wait [#allocation10], 5120  }
  0x77   :  { %2318 = vsyncadd [#allocation10], 4294962176 }
  0x78   :  { %2319 = dma.done.wait [#allocation13], 4096  }
  0x79   :  { %2320 = vsyncadd [#allocation13], 4294963200 }
  0x7a   :  { %2321 = dma.done.wait [#allocation16], 4096  }
  0x7b   :  { %2322 = vsyncadd [#allocation16], 4294963200 }
  0x7c   :  { %2323 = dma.done.wait [#allocation19], 4096  }
  0x7d   :  { %2324 = vsyncadd [#allocation19], 4294963200 }
  0x7e   :  { %2325 = dma.done.wait [#allocation22], 2048  }
  0x7f   :  { %2326 = vsyncadd [#allocation22], 4294965248  ;;  %v1983_v0 = vld [vmem:[#allocation11 + $0x74] ss:$8 sps:$4 sm:$0xff]   ;;  %v1985_v1 = vld [vmem:[#allocation11 + $0x70] ss:$8 sps:$4 sm:$0xff]  }
  0x80   :  { %405 = vmatprep.subr.bf16.mxu0 %v1983_v0  ;;  %553 = vmatprep.subr.bf16.mxu1 %v1983_v0  ;;  %v1986_v2 = vld [vmem:[#allocation11 + $0x64] ss:$8 sps:$4 sm:$0xff]   ;;  %v1988_v3 = vld [vmem:[#allocation11 + $0x60] ss:$8 sps:$4 sm:$0xff]   ;;  %v1989_v4 = vld [vmem:[#allocation11 + $0x54] ss:$8 sps:$4 sm:$0xff]  }
  0x81   :  { %406 = vmatpush1.bf16.msra.mxu0 %v1985_v1  ;;  %554 = vmatpush1.bf16.msra.mxu1 %v1985_v1  ;;  %v1991_v5 = vld [vmem:[#allocation11 + $0x50] ss:$8 sps:$4 sm:$0xff]   ;;  %v1992_v6 = vld [vmem:[#allocation11 + $0x44] ss:$8 sps:$4 sm:$0xff]   ;;  %v1994_v7 = vld [vmem:[#allocation11 + $0x40] ss:$8 sps:$4 sm:$0xff]  }
  0x82   :  { %407 = vmatprep.subr.bf16.mxu0 %v1986_v2  ;;  %555 = vmatprep.subr.bf16.mxu1 %v1986_v2  ;;  %v1995_v8 = vld [vmem:[#allocation11 + $0x34] ss:$8 sps:$4 sm:$0xff]   ;;  %v1997_v9 = vld [vmem:[#allocation11 + $0x30] ss:$8 sps:$4 sm:$0xff]   ;;  %v1998_v10 = vld [vmem:[#allocation11 + $0x24] ss:$8 sps:$4 sm:$0xff]  }
  0x83   :  { %v2000_v11 = vld [vmem:[#allocation11 + $0x20] ss:$8 sps:$4 sm:$0xff]   ;;  %v2001_v12 = vld [vmem:[#allocation11 + $0x14] ss:$8 sps:$4 sm:$0xff]   ;;  %v2003_v18 = vld [vmem:[#allocation11 + $0x10] ss:$8 sps:$4 sm:$0xff]  }
  0x84   :  { %v234_v13 = vld [vmem:[#allocation6 + $0x8] sm:$0xff]  ;;  %v236_v14 = vld [vmem:[#allocation6 + $0x18] sm:$0xff]  ;;  %v233_v38 = vld [vmem:[#allocation6] sm:$0xff]  ;;  %v2345_v56 = vmov 0.0   ;;  %vm511_vm0 = vcmask 1041409   ;;  %vm693_vm1 = vcmask 1041408  }
  0x85   :  { %408 = vmatpush1.bf16.msra.mxu0 %v1988_v3  ;;  %556 = vmatpush1.bf16.msra.mxu1 %v1988_v3  ;;  %v242_v15 = vpack.c.bf16 %v236_v14, %v234_v13  ;;  %v542_v16 = vld [vmem:[#allocation9 + $0x8] sm:$0xff]  ;;  %v544_v17 = vld [vmem:[#allocation9 + $0x18] sm:$0xff]  ;;  %v235_v39 = vld [vmem:[#allocation6 + $0x10] sm:$0xff]  ;;  %197 = vst [vmem:[#allocation2] sm:$0x3] %v2345_v56  ;;  %vm2346_vm2 = vmmov 0  }
  0x86   :  { %409 = vmatprep.subr.bf16.mxu0 %v1989_v4  ;;  %557 = vmatprep.subr.bf16.mxu1 %v1989_v4  ;;  %v550_v19 = vpack.c.bf16 %v544_v17, %v542_v16  ;;  %v2004_v20 = vld [vmem:[#allocation11 + $0x4] ss:$8 sps:$4 sm:$0xff]   ;;  %v2006_v21 = vld [vmem:[#allocation11] ss:$8 sps:$4 sm:$0xff]   ;;  %v2007_v22 = vld [vmem:[#allocation11 + $0xf4] ss:$8 sps:$4 sm:$0xff]   ;;  %v241_v46 = vpack.c.bf16 %v235_v39, %v233_v38 }
  0x87   :  { %437 = vmatprep.mubr.bf16.mxu0 %v242_v15  ;;  %v2009_v23 = vld [vmem:[#allocation11 + $0xf0] ss:$8 sps:$4 sm:$0xff]   ;;  %v2010_v24 = vld [vmem:[#allocation11 + $0xe4] ss:$8 sps:$4 sm:$0xff]   ;;  %v2012_v25 = vld [vmem:[#allocation11 + $0xe0] ss:$8 sps:$4 sm:$0xff]  }
  0x88   :  { %585 = vmatprep.mubr.bf16.mxu1 %v550_v19  ;;  %v2013_v26 = vld [vmem:[#allocation11 + $0xd4] ss:$8 sps:$4 sm:$0xff]   ;;  %v2015_v27 = vld [vmem:[#allocation11 + $0xd0] ss:$8 sps:$4 sm:$0xff]   ;;  %v2016_v28 = vld [vmem:[#allocation11 + $0xc4] ss:$8 sps:$4 sm:$0xff]  }
  0x89   :  { %410 = vmatpush1.bf16.msra.mxu0 %v1991_v5  ;;  %558 = vmatpush1.bf16.msra.mxu1 %v1991_v5  ;;  %v2018_v29 = vld [vmem:[#allocation11 + $0xc0] ss:$8 sps:$4 sm:$0xff]   ;;  %v2019_v30 = vld [vmem:[#allocation11 + $0xb4] ss:$8 sps:$4 sm:$0xff]   ;;  %v2021_v31 = vld [vmem:[#allocation11 + $0xb0] ss:$8 sps:$4 sm:$0xff]  }
  0x8a   :  { %411 = vmatprep.subr.bf16.mxu0 %v1992_v6  ;;  %559 = vmatprep.subr.bf16.mxu1 %v1992_v6  ;;  %v2022_v32 = vld [vmem:[#allocation11 + $0xa4] ss:$8 sps:$4 sm:$0xff]   ;;  %v2024_v33 = vld [vmem:[#allocation11 + $0xa0] ss:$8 sps:$4 sm:$0xff]   ;;  %v2025_v34 = vld [vmem:[#allocation11 + $0x94] ss:$8 sps:$4 sm:$0xff]  }
  0x8b   :  { %v2027_v35 = vld [vmem:[#allocation11 + $0x90] ss:$8 sps:$4 sm:$0xff]   ;;  %v2028_v36 = vld [vmem:[#allocation11 + $0x84] ss:$8 sps:$4 sm:$0xff]   ;;  %v2030_v37 = vld [vmem:[#allocation11 + $0x80] ss:$8 sps:$4 sm:$0xff]  }
  0x8c   :  { %v541_v40 = vld [vmem:[#allocation9] sm:$0xff]  ;;  %v543_v41 = vld [vmem:[#allocation9 + $0x10] sm:$0xff]  ;;  %v238_v42 = vld [vmem:[#allocation6 + $0x28] sm:$0xff]  ;;  %198 = vst [vmem:[#allocation3] sm:$0x3] %v2345_v56 }
  0x8d   :  { %412 = vmatpush1.bf16.msra.mxu0 %v1994_v7  ;;  %560 = vmatpush1.bf16.msra.mxu1 %v1994_v7  ;;  %v240_v43 = vld [vmem:[#allocation6 + $0x38] sm:$0xff]  ;;  %v546_v44 = vld [vmem:[#allocation9 + $0x28] sm:$0xff]  ;;  %v549_v47 = vpack.c.bf16 %v543_v41, %v541_v40  ;;  %v237_v50 = vld [vmem:[#allocation6 + $0x20] sm:$0xff]  ;;  %199 = vst [vmem:[#allocation4] sm:$0x3] %v2345_v56 }
  0x8e   :  { %413 = vmatprep.subr.bf16.mxu0 %v1995_v8  ;;  %561 = vmatprep.subr.bf16.mxu1 %v1995_v8  ;;  %v548_v45 = vld [vmem:[#allocation9 + $0x38] sm:$0xff]  ;;  %v244_v48 = vpack.c.bf16 %v240_v43, %v238_v42  ;;  %v239_v51 = vld [vmem:[#allocation6 + $0x30] sm:$0xff]  ;;  %v545_v52 = vld [vmem:[#allocation9 + $0x20] sm:$0xff]  ;;  %200 = vst [vmem:[#allocation5] sm:$0x3] %v2345_v56 }
  0x8f   :  { %v552_v49 = vpack.c.bf16 %v548_v45, %v546_v44  ;;  %v547_v53 = vld [vmem:[#allocation9 + $0x30] sm:$0xff]  ;;  %v243_v54 = vpack.c.bf16 %v239_v51, %v237_v50  ;;  %v726_v57 = vld [vmem:[#allocation12 + $0x78] sm:$0xff] }
  0x90   :  { %v551_v55 = vpack.c.bf16 %v547_v53, %v545_v52 }
  0x91   :  { %414 = vmatpush1.bf16.msra.mxu0 %v1997_v9  ;;  %562 = vmatpush1.bf16.msra.mxu1 %v1997_v9 }
  0x92   :  { %415 = vmatprep.subr.bf16.mxu0 %v1998_v10  ;;  %563 = vmatprep.subr.bf16.mxu1 %v1998_v10 }
  0x95   :  { %416 = vmatpush1.bf16.msra.mxu0 %v2000_v11  ;;  %564 = vmatpush1.bf16.msra.mxu1 %v2000_v11 }
  0x96   :  { %417 = vmatprep.subr.bf16.mxu0 %v2001_v12  ;;  %565 = vmatprep.subr.bf16.mxu1 %v2001_v12 }
  0x99   :  { %418 = vmatpush1.bf16.msra.mxu0 %v2003_v18  ;;  %566 = vmatpush1.bf16.msra.mxu1 %v2003_v18 }
  0x9a   :  { %419 = vmatprep.subr.bf16.mxu0 %v2004_v20  ;;  %567 = vmatprep.subr.bf16.mxu1 %v2004_v20 }
  0x9d   :  { %420 = vmatpush1.bf16.msra.mxu0 %v2006_v21  ;;  %568 = vmatpush1.bf16.msra.mxu1 %v2006_v21 }
  0x9e   :  { %421 = vmatprep.subr.bf16.mxu0 %v2007_v22  ;;  %569 = vmatprep.subr.bf16.mxu1 %v2007_v22 }
  0xa1   :  { %422 = vmatpush2.bf16.msra.mxu0 %v2009_v23  ;;  %570 = vmatpush2.bf16.msra.mxu1 %v2009_v23 }
  0xa2   :  { %423 = vmatprep.subr.bf16.mxu0 %v2010_v24  ;;  %571 = vmatprep.subr.bf16.mxu1 %v2010_v24 }
  0xa5   :  { %424 = vmatpush2.bf16.msra.mxu0 %v2012_v25  ;;  %572 = vmatpush2.bf16.msra.mxu1 %v2012_v25 }
  0xa6   :  { %425 = vmatprep.subr.bf16.mxu0 %v2013_v26  ;;  %573 = vmatprep.subr.bf16.mxu1 %v2013_v26 }
  0xa9   :  { %426 = vmatpush2.bf16.msra.mxu0 %v2015_v27  ;;  %574 = vmatpush2.bf16.msra.mxu1 %v2015_v27 }
  0xaa   :  { %427 = vmatprep.subr.bf16.mxu0 %v2016_v28  ;;  %575 = vmatprep.subr.bf16.mxu1 %v2016_v28 }
  0xad   :  { %428 = vmatpush2.bf16.msra.mxu0 %v2018_v29  ;;  %576 = vmatpush2.bf16.msra.mxu1 %v2018_v29 }
  0xae   :  { %429 = vmatprep.subr.bf16.mxu0 %v2019_v30  ;;  %577 = vmatprep.subr.bf16.mxu1 %v2019_v30 }
  0xb1   :  { %430 = vmatpush2.bf16.msra.mxu0 %v2021_v31  ;;  %578 = vmatpush2.bf16.msra.mxu1 %v2021_v31 }
  0xb2   :  { %431 = vmatprep.subr.bf16.mxu0 %v2022_v32  ;;  %579 = vmatprep.subr.bf16.mxu1 %v2022_v32 }
  0xb5   :  { %432 = vmatpush2.bf16.msra.mxu0 %v2024_v33  ;;  %580 = vmatpush2.bf16.msra.mxu1 %v2024_v33 }
  0xb6   :  { %433 = vmatprep.subr.bf16.mxu0 %v2025_v34  ;;  %581 = vmatprep.subr.bf16.mxu1 %v2025_v34 }
  0xb9   :  { %434 = vmatpush2.bf16.msra.mxu0 %v2027_v35  ;;  %582 = vmatpush2.bf16.msra.mxu1 %v2027_v35 }
  0xba   :  { %435 = vmatprep.subr.bf16.mxu0 %v2028_v36  ;;  %583 = vmatprep.subr.bf16.mxu1 %v2028_v36 }
  0xbd   :  { %436 = vmatpush2.bf16.msra.mxu0 %v2030_v37  ;;  %584 = vmatpush2.bf16.msra.mxu1 %v2030_v37 }
  0xbe   :  { %1685 = vmatprep.subr.mxu0 %v2345_v56  ;;  %1720 = vmatprep.subr.mxu1 %v2345_v56 }
  0xc0   :  { %438 = vmatmul.mubr.bf16.vlgmr.msra.gmra.mxu0 %v241_v46  ;;  %586 = vmatmul.mubr.bf16.vlgmr.msra.gmra.mxu1 %v549_v47 }
  0xc1   :  { %447 = vmatprep.mubr.bf16.mxu0 %v244_v48  ;;  %595 = vmatprep.mubr.bf16.mxu1 %v552_v49 }
  0xc2   :  { %1686 = vmatpush3.msra.mxu0 %v726_v57  ;;  %1721 = vmatpush3.msra.mxu1 %v726_v57 }
  0xc3   :  { %1687 = vmatprep.subr.mxu0 %v2345_v56  ;;  %1722 = vmatprep.subr.mxu1 %v2345_v56 }
  0xc8   :  { %448 = vmatmul.mubr.bf16.gmra.mxu0 %v243_v54  ;;  %596 = vmatmul.mubr.bf16.gmra.mxu1 %v551_v55 }
  0xc9   :  { %1717 = vmatprep.mubr.msk.f32.mxu0 %vm2346_vm2, %v2345_v56  ;;  %1752 = vmatprep.mubr.msk.f32.mxu1 %vm2346_vm2, %v2345_v56 }
 0x180   :  { %v439_v58 = vpop.f32.mrf.mxu0  ;;  %v587_v59 = vpop.f32.mrf.mxu1 }
 0x181   :  { %v606_v60 = vmul.f32 %v587_v59, %v587_v59  ;;  %v458_v63 = vmul.f32 %v439_v58, %v439_v58 }
 0x182   :  { %v441_v61 = vpop.f32.mrf.mxu0  ;;  %v589_v62 = vpop.f32.mrf.mxu1 }
 0x183   :  { %v462_v0 = vmul.f32 %v441_v61, %v441_v61  ;;  %v610_v1 = vmul.f32 %v589_v62, %v589_v62 }
 0x184   :  { %v443_v2 = vpop.f32.mrf.mxu0  ;;  %v591_v3 = vpop.f32.mrf.mxu1 }
 0x185   :  { %v466_v4 = vadd.f32 %v462_v0, %v458_v63  ;;  %v614_v5 = vadd.f32 %v610_v1, %v606_v60  ;;  %v459_v6 = vmul.f32 %v443_v2, %v443_v2  ;;  %v607_v7 = vmul.f32 %v591_v3, %v591_v3 }
 0x186   :  { %v445_v8 = vpop.f32.mrf.mxu0  ;;  %v593_v9 = vpop.f32.mrf.mxu1 }
 0x187   :  { %v470_v10 = vadd.f32 1e-08, %v466_v4  ;;  %v618_v11 = vadd.f32 1e-08, %v614_v5  ;;  %v463_v12 = vmul.f32 %v445_v8, %v445_v8  ;;  %v611_v13 = vmul.f32 %v593_v9, %v593_v9 }
 0x188   :  { %v449_v14 = vpop.f32.mrf.mxu0  ;;  %v597_v15 = vpop.f32.mrf.mxu1 }
 0x189   :  { %2031 = vlog2.f32 %v470_v10  ;;  %v467_v16 = vadd.f32 %v463_v12, %v459_v6  ;;  %v615_v17 = vadd.f32 %v611_v13, %v607_v7  ;;  %v460_v18 = vmul.f32 %v449_v14, %v449_v14 }
 0x18a   :  { %2033 = vlog2.f32 %v618_v11  ;;  %v608_v19 = vmul.f32 %v597_v15, %v597_v15  ;;  %v451_v20 = vpop.f32.mrf.mxu0  ;;  %v599_v21 = vpop.f32.mrf.mxu1 }
 0x18b   :  { %v471_v22 = vadd.f32 1e-08, %v467_v16  ;;  %v619_v23 = vadd.f32 1e-08, %v615_v17  ;;  %v464_v24 = vmul.f32 %v451_v20, %v451_v20  ;;  %v612_v25 = vmul.f32 %v599_v21, %v599_v21 }
 0x18c   :  { %v453_v26 = vpop.f32.mrf.mxu0  ;;  %v601_v27 = vpop.f32.mrf.mxu1 }
 0x18d   :  { %2035 = vlog2.f32 %v471_v22  ;;  %v468_v28 = vadd.f32 %v464_v24, %v460_v18  ;;  %v616_v29 = vadd.f32 %v612_v25, %v608_v19  ;;  %v461_v30 = vmul.f32 %v453_v26, %v453_v26 }
 0x18e   :  { %2037 = vlog2.f32 %v619_v23  ;;  %v609_v31 = vmul.f32 %v601_v27, %v601_v27  ;;  %v455_v32 = vpop.f32.mrf.mxu0  ;;  %v603_v33 = vpop.f32.mrf.mxu1 }
 0x18f   :  { %v472_v34 = vadd.f32 1e-08, %v468_v28  ;;  %v620_v35 = vadd.f32 1e-08, %v616_v29  ;;  %v465_v36 = vmul.f32 %v455_v32, %v455_v32  ;;  %v613_v37 = vmul.f32 %v603_v33, %v603_v33 }
 0x191   :  { %2039 = vlog2.f32 %v472_v34  ;;  %v469_v38 = vadd.f32 %v465_v36, %v461_v30  ;;  %v617_v39 = vadd.f32 %v613_v37, %v609_v31 }
 0x192   :  { %2041 = vlog2.f32 %v620_v35 }
 0x193   :  { %v473_v40 = vadd.f32 1e-08, %v469_v38  ;;  %v621_v41 = vadd.f32 1e-08, %v617_v39 }
 0x195   :  { %2043 = vlog2.f32 %v473_v40 }
 0x196   :  { %v2032_v42 = vpop.eup %2031  ;;  %2045 = vlog2.f32 %v621_v41 }
 0x197   :  { %v2034_v43 = vpop.eup %2033  ;;  %v475_v44 = vmul.f32 0.6931472, %v2032_v42 }
 0x198   :  { %v623_v45 = vmul.f32 0.6931472, %v2034_v43 }
 0x199   :  { %v482_v46 = vmul.f32 0.15, %v475_v44 }
 0x19a   :  { %v2036_v47 = vpop.eup %2035  ;;  %v630_v48 = vmul.f32 0.15, %v623_v45 }
 0x19b   :  { %v2038_v49 = vpop.eup %2037  ;;  %v486_v50 = vmul.f32 1.442695, %v482_v46  ;;  %v477_v51 = vmul.f32 0.6931472, %v2036_v47 }
 0x19c   :  { %v634_v52 = vmul.f32 1.442695, %v630_v48  ;;  %v625_v53 = vmul.f32 0.6931472, %v2038_v49 }
 0x19d   :  { %v483_v54 = vmul.f32 0.15, %v477_v51  ;;  %2047 = vpow2.f32 %v486_v50 }
 0x19e   :  { %v2040_v55 = vpop.eup %2039  ;;  %v631_v57 = vmul.f32 0.15, %v625_v53  ;;  %2049 = vpow2.f32 %v634_v52 }
 0x19f   :  { %v2042_v58 = vpop.eup %2041  ;;  %v488_v59 = vmul.f32 1.442695, %v483_v54  ;;  %v479_v60 = vmul.f32 0.6931472, %v2040_v55 }
 0x1a0   :  { %v636_v61 = vmul.f32 1.442695, %v631_v57  ;;  %v627_v62 = vmul.f32 0.6931472, %v2042_v58 }
 0x1a1   :  { %2051 = vpow2.f32 %v488_v59  ;;  %v484_v63 = vmul.f32 0.15, %v479_v60 }
 0x1a2   :  { %v2044_v0 = vpop.eup %2043  ;;  %2053 = vpow2.f32 %v636_v61  ;;  %v632_v1 = vmul.f32 0.15, %v627_v62 }
 0x1a3   :  { %v2046_v2 = vpop.eup %2045  ;;  %v490_v3 = vmul.f32 1.442695, %v484_v63  ;;  %v481_v4 = vmul.f32 0.6931472, %v2044_v0 }
 0x1a4   :  { %v638_v5 = vmul.f32 1.442695, %v632_v1  ;;  %v629_v6 = vmul.f32 0.6931472, %v2046_v2 }
 0x1a5   :  { %v485_v7 = vmul.f32 0.15, %v481_v4  ;;  %2055 = vpow2.f32 %v490_v3 }
 0x1a6   :  { %v633_v8 = vmul.f32 0.15, %v629_v6  ;;  %2057 = vpow2.f32 %v638_v5 }
 0x1a7   :  { %v492_v9 = vmul.f32 1.442695, %v485_v7 }
 0x1a8   :  { %v640_v10 = vmul.f32 1.442695, %v633_v8 }
 0x1a9   :  { %2059 = vpow2.f32 %v492_v9 }
 0x1aa   :  { %2061 = vpow2.f32 %v640_v10  ;;  %v2048_v11 = vpop.eup %2047 }
 0x1ab   :  { %v2050_v12 = vpop.eup %2049  ;;  %v517_v15 = vmul.f32 %v2048_v11, %v2048_v11 }
 0x1ac   :  { %v664_v18 = vmul.f32 %v2050_v12, %v2050_v12 }
 0x1ae   :  { %v2052_v13 = vpop.eup %2051 }
 0x1af   :  { %v2054_v14 = vpop.eup %2053  ;;  %v495_v16 = vadd.f32 %v2052_v13, %v2048_v11  ;;  %v518_v17 = vmul.f32 %v2052_v13, %v2052_v13  ;;  %v494_v11 = vld [vmem:[#allocation2] sm:$0x3] }
 0x1b0   :  { %v643_v19 = vadd.f32 %v2054_v14, %v2050_v12  ;;  %v665_v20 = vmul.f32 %v2054_v14, %v2054_v14 }
 0x1b1   :  { %v496_v21 = vrot.slane %v495_v16, 4  ;;  %v521_v22 = vadd.f32 %v518_v17, %v517_v15  ;;  %v642_v15 = vld [vmem:[#allocation4] sm:$0x3] }
 0x1b2   :  { %v644_v23 = vrot.slane %v643_v19, 4  ;;  %v668_v24 = vadd.f32 %v665_v20, %v664_v18  ;;  %v2056_v27 = vpop.eup %2055  ;;  %v516_v20 = vld [vmem:[#allocation3] sm:$0x3] }
 0x1b3   :  { %v497_v25 = vadd.f32 %v496_v21, %v495_v16  ;;  %v522_v26 = vrot.slane %v521_v22, 4  ;;  %v2058_v30 = vpop.eup %2057  ;;  %v519_v36 = vmul.f32 %v2056_v27, %v2056_v27 }
 0x1b4   :  { %v645_v28 = vadd.f32 %v644_v23, %v643_v19  ;;  %v669_v29 = vrot.slane %v668_v24, 4  ;;  %v666_v40 = vmul.f32 %v2058_v30, %v2058_v30 }
 0x1b5   :  { %v523_v31 = vadd.f32 %v522_v26, %v521_v22  ;;  %v498_v35 = vrot.slane %v497_v25, 2 }
 0x1b6   :  { %v2060_v32 = vpop.eup %2059  ;;  %v670_v33 = vadd.f32 %v669_v29, %v668_v24  ;;  %v646_v39 = vrot.slane %v645_v28, 2 }
 0x1b7   :  { %v2062_v34 = vpop.eup %2061  ;;  %v502_v37 = vadd.f32 %v2060_v32, %v2056_v27  ;;  %v520_v38 = vmul.f32 %v2060_v32, %v2060_v32  ;;  %v524_v43 = vrot.slane %v523_v31, 2  ;;  %v499_v49 = vadd.f32 %v498_v35, %v497_v25  ;;  %v663_v25 = vld [vmem:[#allocation5] sm:$0x3] }
 0x1b8   :  { %v650_v41 = vadd.f32 %v2062_v34, %v2058_v30  ;;  %v667_v42 = vmul.f32 %v2062_v34, %v2062_v34  ;;  %v671_v46 = vrot.slane %v670_v33, 2  ;;  %v647_v52 = vadd.f32 %v646_v39, %v645_v28 }
 0x1b9   :  { %v503_v44 = vrot.slane %v502_v37, 4  ;;  %v528_v45 = vadd.f32 %v520_v38, %v519_v36  ;;  %v525_v55 = vadd.f32 %v524_v43, %v523_v31  ;;  %v500_v62 = vrot.slane %v499_v49, 1  ;;  %v722_v43 = vld [vmem:[#allocation12 + $0x58] sm:$0xff] }
 0x1ba   :  { %v651_v47 = vrot.slane %v650_v41, 4  ;;  %v675_v48 = vadd.f32 %v667_v42, %v666_v40  ;;  %v672_v59 = vadd.f32 %v671_v46, %v670_v33  ;;  %v648_v1 = vrot.slane %v647_v52, 1  ;;  %v725_v40 = vld [vmem:[#allocation12 + $0x70] sm:$0xff]  ;;  %v723_v42 = vld [vmem:[#allocation12 + $0x60] sm:$0xff] }
 0x1bb   :  { %v504_v50 = vadd.f32 %v503_v44, %v502_v37  ;;  %v529_v51 = vrot.slane %v528_v45, 4  ;;  %v526_v4 = vrot.slane %v525_v55, 1  ;;  %v501_v10 = vadd.f32 %v500_v62, %v499_v49  ;;  %1688 = vmatpush3.msra.mxu0 %v725_v40  ;;  %1723 = vmatpush3.msra.mxu1 %v725_v40  ;;  %v721_v44 = vld [vmem:[#allocation12 + $0x50] sm:$0xff]  ;;  %v719_v46 = vld [vmem:[#allocation12 + $0x40] sm:$0xff]  ;;  %v716_v49 = vld [vmem:[#allocation12 + $0x28] sm:$0xff] }
 0x1bc   :  { %v652_v53 = vadd.f32 %v651_v47, %v650_v41  ;;  %v676_v54 = vrot.slane %v675_v48, 4  ;;  %v673_v7 = vrot.slane %v672_v59, 1  ;;  %v649_v14 = vadd.f32 %v648_v1, %v647_v52  ;;  %1689 = vmatprep.subr.mxu0 %v2345_v56  ;;  %v724_v41 = vld [vmem:[#allocation12 + $0x68] sm:$0xff]  ;;  %1724 = vmatprep.subr.mxu1 %v2345_v56  ;;  %v718_v47 = vld [vmem:[#allocation12 + $0x38] sm:$0xff]  ;;  %v713_v52 = vld [vmem:[#allocation12 + $0x10] sm:$0xff] }
 0x1bd   :  { %v505_v57 = vrot.slane %v504_v50, 2  ;;  %v530_v58 = vadd.f32 %v529_v51, %v528_v45  ;;  %v527_v18 = vadd.f32 %v526_v4, %v525_v55  ;;  %1690 = vmatpush3.msra.mxu0 %v724_v41  ;;  %1725 = vmatpush3.msra.mxu1 %v724_v41  ;;  %v720_v45 = vld [vmem:[#allocation12 + $0x48] sm:$0xff]  ;;  %v714_v51 = vld [vmem:[#allocation12 + $0x18] sm:$0xff]  ;;  %v934_v41 = vld [vmem:[#allocation15 + $0x50] sm:$0xff] }
 0x1be   :  { %v653_v60 = vrot.slane %v652_v53, 2  ;;  %v677_v61 = vadd.f32 %v676_v54, %v675_v48  ;;  %v674_v22 = vadd.f32 %v673_v7, %v672_v59  ;;  %1691 = vmatprep.subr.mxu0 %v2345_v56  ;;  %1726 = vmatprep.subr.mxu1 %v2345_v56  ;;  %v717_v48 = vld [vmem:[#allocation12 + $0x30] sm:$0xff]  ;;  %v711_v54 = vld [vmem:[#allocation12] sm:$0xff] }
 0x1bf   :  { %v506_v63 = vadd.f32 %v505_v57, %v504_v50  ;;  %v531_v0 = vrot.slane %v530_v58, 2  ;;  %1692 = vmatpush3.msra.mxu0 %v723_v42  ;;  %1727 = vmatpush3.msra.mxu1 %v723_v42  ;;  %v715_v50 = vld [vmem:[#allocation12 + $0x20] sm:$0xff] }
 0x1c0   :  { %v654_v2 = vadd.f32 %v653_v60, %v652_v53  ;;  %v678_v3 = vrot.slane %v677_v61, 2  ;;  %1693 = vmatprep.subr.mxu0 %v2345_v56  ;;  %1728 = vmatprep.subr.mxu1 %v2345_v56  ;;  %v712_v53 = vld [vmem:[#allocation12 + $0x8] sm:$0xff]  ;;  %v916_v42 = vld [vmem:[#allocation14 + $0x40] sm:$0xff] }
 0x1c1   :  { %v507_v5 = vrot.slane %v506_v63, 1  ;;  %v532_v6 = vadd.f32 %v531_v0, %v530_v58  ;;  %1694 = vmatpush3.msra.mxu0 %v722_v43  ;;  %1729 = vmatpush3.msra.mxu1 %v722_v43  ;;  %v933_v43 = vld [vmem:[#allocation15 + $0x48] sm:$0xff] }
 0x1c2   :  { %v655_v8 = vrot.slane %v654_v2, 1  ;;  %v679_v9 = vadd.f32 %v678_v3, %v677_v61  ;;  %1695 = vmatprep.subr.mxu0 %v2345_v56  ;;  %1730 = vmatprep.subr.mxu1 %v2345_v56 }
 0x1c3   :  { %v508_v12 = vadd.f32 %v507_v5, %v506_v63  ;;  %v533_v13 = vrot.slane %v532_v6, 1  ;;  %1696 = vmatpush3.msra.mxu0 %v721_v44  ;;  %1731 = vmatpush3.msra.mxu1 %v721_v44  ;;  %v915_v44 = vld [vmem:[#allocation14 + $0x38] sm:$0xff] }
 0x1c4   :  { %v656_v16 = vadd.f32 %v655_v8, %v654_v2  ;;  %v680_v17 = vrot.slane %v679_v9, 1  ;;  %1697 = vmatprep.subr.mxu0 %v2345_v56  ;;  %1732 = vmatprep.subr.mxu1 %v2345_v56 }
 0x1c5   :  { %v512_v19 = vsel %vm511_vm0, %v508_v12, %v501_v10  ;;  %v534_v21 = vadd.f32 %v533_v13, %v532_v6  ;;  %1698 = vmatpush3.msra.mxu0 %v720_v45  ;;  %1733 = vmatpush3.msra.mxu1 %v720_v45  ;;  %v932_v45 = vld [vmem:[#allocation15 + $0x40] sm:$0xff] }
 0x1c6   :  { %v514_v23 = vadd.f32 %v512_v19, %v494_v11  ;;  %v659_v24 = vsel %vm511_vm0, %v656_v16, %v649_v14  ;;  %v681_v26 = vadd.f32 %v680_v17, %v679_v9  ;;  %1699 = vmatprep.subr.mxu0 %v2345_v56  ;;  %1734 = vmatprep.subr.mxu1 %v2345_v56  ;;  %v922_v19 = vld [vmem:[#allocation14 + $0x70] sm:$0xff] }
 0x1c7   :  { %v537_v27 = vsel %vm511_vm0, %v534_v21, %v527_v18  ;;  %v661_v28 = vadd.f32 %v659_v24, %v642_v15  ;;  %1700 = vmatpush3.msra.mxu0 %v719_v46  ;;  %1735 = vmatpush3.msra.mxu1 %v719_v46  ;;  %v923_v18 = vld [vmem:[#allocation14 + $0x78] sm:$0xff]  ;;  %v938_v21 = vld [vmem:[#allocation15 + $0x70] sm:$0xff]  ;;  %v920_v24 = vld [vmem:[#allocation14 + $0x60] sm:$0xff] }
 0x1c8   :  { %v539_v29 = vadd.f32 %v537_v27, %v516_v20  ;;  %515 = vst [vmem:[#allocation2] sm:$0x3] %v514_v23  ;;  %v684_v30 = vsel %vm511_vm0, %v681_v26, %v674_v22  ;;  %1701 = vmatprep.subr.mxu0 %v2345_v56  ;;  %1736 = vmatprep.subr.mxu1 %v2345_v56  ;;  %v939_v20 = vld [vmem:[#allocation15 + $0x78] sm:$0xff]  ;;  %v921_v22 = vld [vmem:[#allocation14 + $0x68] sm:$0xff]  ;;  %v914_v46 = vld [vmem:[#allocation14 + $0x30] sm:$0xff] }
 0x1c9   :  { %v686_v31 = vadd.f32 %v684_v30, %v663_v25  ;;  %662 = vst [vmem:[#allocation4] sm:$0x3] %v661_v28  ;;  %1702 = vmatpush3.msra.mxu0 %v718_v47  ;;  %1737 = vmatpush3.msra.mxu1 %v718_v47  ;;  %v937_v23 = vld [vmem:[#allocation15 + $0x68] sm:$0xff]  ;;  %v936_v25 = vld [vmem:[#allocation15 + $0x60] sm:$0xff]  ;;  %v919_v26 = vld [vmem:[#allocation14 + $0x58] sm:$0xff] }
 0x1ca   :  { %540 = vst [vmem:[#allocation3] sm:$0x3] %v539_v29  ;;  %1703 = vmatprep.subr.mxu0 %v2345_v56  ;;  %1738 = vmatprep.subr.mxu1 %v2345_v56  ;;  %v935_v27 = vld [vmem:[#allocation15 + $0x58] sm:$0xff]  ;;  %v918_v28 = vld [vmem:[#allocation14 + $0x50] sm:$0xff]  ;;  %v917_v29 = vld [vmem:[#allocation14 + $0x48] sm:$0xff] }
 0x1cb   :  { %687 = vst [vmem:[#allocation5] sm:$0x3] %v686_v31  ;;  %1704 = vmatpush3.msra.mxu0 %v717_v48  ;;  %1739 = vmatpush3.msra.mxu1 %v717_v48  ;;  %v1542_v30 = vld [vmem:[%s2703_s4] ss:$0 sm:$0xff]  ;;  %v913_v48 = vld [vmem:[#allocation14 + $0x28] sm:$0xff] }
 0x1cc   :  { %1705 = vmatprep.subr.mxu0 %v2345_v56  ;;  %1740 = vmatprep.subr.mxu1 %v2345_v56  ;;  %v931_v47 = vld [vmem:[#allocation15 + $0x38] sm:$0xff] }
 0x1cd   :  { %1706 = vmatpush3.msra.mxu0 %v716_v49  ;;  %1741 = vmatpush3.msra.mxu1 %v716_v49  ;;  %v930_v49 = vld [vmem:[#allocation15 + $0x30] sm:$0xff] }
 0x1ce   :  { %1707 = vmatprep.subr.mxu0 %v2345_v56  ;;  %1742 = vmatprep.subr.mxu1 %v2345_v56 }
 0x1cf   :  { %v2511_v32 = vld [vmem:[#allocation2] sm:$0x3]  ;;  %1708 = vmatpush3.msra.mxu0 %v715_v50  ;;  %1743 = vmatpush3.msra.mxu1 %v715_v50  ;;  %v912_v50 = vld [vmem:[#allocation14 + $0x20] sm:$0xff] }
 0x1d0   :  { %v694_v33 = vsel %vm693_vm1, %v2511_v32, 0.0  ;;  %v2515_v35 = vld [vmem:[#allocation4] sm:$0x3]  ;;  %1709 = vmatprep.subr.mxu0 %v2345_v56  ;;  %1744 = vmatprep.subr.mxu1 %v2345_v56  ;;  %v706_v10 = vmul.f32 0.0625, %v2511_v32 }
 0x1d1   :  { %695 = vadd.xlane.f32.xlu0 %v694_v33  ;;  %v692_v34 = vld [vmem:[#allocation3] sm:$0x3]  ;;  %v813_v38 = vsel %vm693_vm1, %v2515_v35, 0.0  ;;  %1710 = vmatpush3.msra.mxu0 %v714_v51  ;;  %v825_v13 = vmul.f32 0.0625, %v2515_v35 }
 0x1d2   :  { %v697_v36 = vsel %vm693_vm1, %v692_v34, 0.0  ;;  %v812_v37 = vld [vmem:[#allocation5] sm:$0x3]  ;;  %1745 = vmatpush3.msra.mxu1 %v714_v51  ;;  %1711 = vmatprep.subr.mxu0 %v2345_v56  ;;  %v929_v51 = vld [vmem:[#allocation15 + $0x28] sm:$0xff] }
 0x1d3   :  { %698 = vadd.xlane.f32.xlu1 %v697_v36  ;;  %v816_v39 = vsel %vm693_vm1, %v812_v37, 0.0  ;;  %1746 = vmatprep.subr.mxu1 %v2345_v56 }
 0x1d4   :  { %1712 = vmatpush3.msra.mxu0 %v713_v52  ;;  %1747 = vmatpush3.msra.mxu1 %v713_v52  ;;  %v911_v52 = vld [vmem:[#allocation14 + $0x18] sm:$0xff] }
 0x1d5   :  { %814 = vadd.xlane.f32.xlu0 %v813_v38  ;;  %1713 = vmatprep.subr.mxu0 %v2345_v56 }
 0x1d6   :  { %1714 = vmatpush3.msra.mxu0 %v712_v53  ;;  %1748 = vmatprep.subr.mxu1 %v2345_v56 }
 0x1d7   :  { %817 = vadd.xlane.f32.xlu1 %v816_v39  ;;  %1715 = vmatprep.subr.mxu0 %v2345_v56 }
 0x1d8   :  { %1749 = vmatpush3.msra.mxu1 %v712_v53  ;;  %1716 = vmatpush3.msra.mxu0 %v711_v54  ;;  %v928_v53 = vld [vmem:[#allocation15 + $0x20] sm:$0xff] }
 0x1d9   :  { %1750 = vmatprep.subr.mxu1 %v2345_v56  ;;  %1755 = vmatprep.subr.mxu0 %v2345_v56 }
 0x1da   :  { %1751 = vmatpush3.msra.mxu1 %v711_v54  ;;  %v910_v54 = vld [vmem:[#allocation14 + $0x10] sm:$0xff] }
 0x1db   :  { %1790 = vmatprep.subr.mxu1 %v2345_v56 }
 0x25a   :  { %v696_v55 = vpop.xlane.xlu0 %695 }
 0x25b   :  { %v700_v57 = vmul.f32 0.00048828125, %v696_v55  ;;  %v927_v55 = vld [vmem:[#allocation15 + $0x18] sm:$0xff] }
 0x25c   :  { %v699_v59 = vpop.xlane.xlu1 %698 }
 0x25d   :  { %v701_v58 = vmul.f32 2048.0, %v700_v57  ;;  %v707_v11 = vsub.f32 %v706_v10, %v700_v57  ;;  %v1102_v10 = vld [vmem:[#allocation17 + $0x58] sm:$0xff] }
 0x25e   :  { %v815_v60 = vpop.xlane.xlu0 %814 }
 0x25f   :  { %v702_v61 = vmul.f32 %v701_v58, %v700_v57  ;;  %v819_v62 = vmul.f32 0.00048828125, %v815_v60  ;;  %v909_v57 = vld [vmem:[#allocation14 + $0x8] sm:$0xff]  ;;  %v926_v58 = vld [vmem:[#allocation15 + $0x10] sm:$0xff] }
 0x260   :  { %v818_v3 = vpop.xlane.xlu1 %817  ;;  %v925_v60 = vld [vmem:[#allocation15 + $0x8] sm:$0xff] }
 0x261   :  { %v703_v63 = vsub.f32 %v699_v59, %v702_v61  ;;  %v820_v0 = vmul.f32 2048.0, %v819_v62  ;;  %v826_v15 = vsub.f32 %v825_v13, %v819_v62  ;;  %v908_v59 = vld [vmem:[#allocation14] sm:$0xff] }
 0x262   :  { %v924_v61 = vld [vmem:[#allocation15] sm:$0xff] }
 0x263   :  { %v704_v1 = vmax.f32 %v703_v63, 0.0  ;;  %v821_v2 = vmul.f32 %v820_v0, %v819_v62  ;;  %v1099_v13 = vld [vmem:[#allocation17 + $0x40] sm:$0xff] }
 0x265   :  { %v705_v4 = vmul.f32 0.0004885198, %v704_v1  ;;  %v822_v5 = vsub.f32 %v818_v3, %v821_v2 }
 0x267   :  { %v708_v6 = vadd.f32 1e-08, %v705_v4  ;;  %v823_v7 = vmax.f32 %v822_v5, 0.0 }
 0x269   :  { %2063 = vrsqrt.f32 %v708_v6  ;;  %v824_v8 = vmul.f32 0.0004885198, %v823_v7  ;;  %v1106_v6 = vld [vmem:[#allocation17 + $0x78] sm:$0xff]  ;;  %v1105_v7 = vld [vmem:[#allocation17 + $0x70] sm:$0xff] }
 0x26b   :  { %v827_v9 = vadd.f32 1e-08, %v824_v8  ;;  %v1104_v8 = vld [vmem:[#allocation17 + $0x68] sm:$0xff] }
 0x26d   :  { %2065 = vrsqrt.f32 %v827_v9  ;;  %v1103_v9 = vld [vmem:[#allocation17 + $0x60] sm:$0xff] }
 0x276   :  { %v2064_v12 = vpop.eup %2063 }
 0x277   :  { %v710_v14 = vmul.f32 %v2064_v12, %v707_v11  ;;  %v1101_v11 = vld [vmem:[#allocation17 + $0x50] sm:$0xff]  ;;  %v1100_v12 = vld [vmem:[#allocation17 + $0x48] sm:$0xff] }
 0x279   :  { %1718 = vmatmul.mubr.f32.vlgmr.msra.gmra.mxu0 %v710_v14  ;;  %v1098_v14 = vld [vmem:[#allocation17 + $0x38] sm:$0xff] }
 0x27a   :  { %v2066_v16 = vpop.eup %2065  ;;  %1787 = vmatprep.mubr.msk.f32.mxu0 %vm2346_vm2, %v2345_v56  ;;  %1756 = vmatpush3.msra.mxu0 %v939_v20  ;;  %v1092_v20 = vld [vmem:[#allocation17 + $0x8] sm:$0xff] }
 0x27b   :  { %v829_v17 = vmul.f32 %v2066_v16, %v826_v15  ;;  %1757 = vmatprep.subr.mxu0 %v2345_v56  ;;  %v1097_v15 = vld [vmem:[#allocation17 + $0x30] sm:$0xff]  ;;  %v1096_v16 = vld [vmem:[#allocation17 + $0x28] sm:$0xff] }
 0x27c   :  { %1758 = vmatpush3.msra.mxu0 %v938_v21  ;;  %v1091_v21 = vld [vmem:[#allocation17] sm:$0xff] }
 0x27d   :  { %1753 = vmatmul.mubr.f32.vlgmr.msra.gmra.mxu1 %v829_v17  ;;  %1759 = vmatprep.subr.mxu0 %v2345_v56  ;;  %v1095_v17 = vld [vmem:[#allocation17 + $0x20] sm:$0xff] }
 0x27e   :  { %1822 = vmatprep.mubr.msk.f32.mxu1 %vm2346_vm2, %v2345_v56  ;;  %1791 = vmatpush3.msra.mxu1 %v923_v18  ;;  %v1094_v18 = vld [vmem:[#allocation17 + $0x18] sm:$0xff] }
 0x27f   :  { %1792 = vmatprep.subr.mxu1 %v2345_v56  ;;  %1760 = vmatpush3.msra.mxu0 %v937_v23  ;;  %v1198_v23 = vld [vmem:[#allocation18 + $0x70] sm:$0xff] }
 0x280   :  { %1793 = vmatpush3.msra.mxu1 %v922_v19  ;;  %1761 = vmatprep.subr.mxu0 %v2345_v56  ;;  %v1093_v19 = vld [vmem:[#allocation17 + $0x10] sm:$0xff] }
 0x281   :  { %1794 = vmatprep.subr.mxu1 %v2345_v56  ;;  %1762 = vmatpush3.msra.mxu0 %v936_v25  ;;  %v1196_v25 = vld [vmem:[#allocation18 + $0x60] sm:$0xff] }
 0x282   :  { %1795 = vmatpush3.msra.mxu1 %v921_v22  ;;  %1763 = vmatprep.subr.mxu0 %v2345_v56  ;;  %v1199_v22 = vld [vmem:[#allocation18 + $0x78] sm:$0xff] }
 0x283   :  { %1796 = vmatprep.subr.mxu1 %v2345_v56  ;;  %1764 = vmatpush3.msra.mxu0 %v935_v27  ;;  %v1194_v27 = vld [vmem:[#allocation18 + $0x50] sm:$0xff] }
 0x284   :  { %1797 = vmatpush3.msra.mxu1 %v920_v24  ;;  %1765 = vmatprep.subr.mxu0 %v2345_v56  ;;  %v1197_v24 = vld [vmem:[#allocation18 + $0x68] sm:$0xff] }
 0x285   :  { %1798 = vmatprep.subr.mxu1 %v2345_v56  ;;  %1766 = vmatpush3.msra.mxu0 %v934_v41 }
 0x286   :  { %1799 = vmatpush3.msra.mxu1 %v919_v26  ;;  %1767 = vmatprep.subr.mxu0 %v2345_v56  ;;  %v1195_v26 = vld [vmem:[#allocation18 + $0x58] sm:$0xff] }
 0x287   :  { %1800 = vmatprep.subr.mxu1 %v2345_v56  ;;  %1768 = vmatpush3.msra.mxu0 %v933_v43 }
 0x288   :  { %1801 = vmatpush3.msra.mxu1 %v918_v28  ;;  %1769 = vmatprep.subr.mxu0 %v2345_v56  ;;  %v1193_v28 = vld [vmem:[#allocation18 + $0x48] sm:$0xff] }
 0x289   :  { %1802 = vmatprep.subr.mxu1 %v2345_v56  ;;  %1770 = vmatpush3.msra.mxu0 %v932_v45  ;;  %v1185_v45 = vld [vmem:[#allocation18 + $0x8] sm:$0xff] }
 0x28a   :  { %1803 = vmatpush3.msra.mxu1 %v917_v29  ;;  %1771 = vmatprep.subr.mxu0 %v2345_v56  ;;  %v1192_v29 = vld [vmem:[#allocation18 + $0x40] sm:$0xff] }
 0x28b   :  { %1804 = vmatprep.subr.mxu1 %v2345_v56  ;;  %1772 = vmatpush3.msra.mxu0 %v931_v47  ;;  %v1295_v47 = vld [vmem:[#allocation20 + $0x78] sm:$0xff] }
 0x28c   :  { %1805 = vmatpush3.msra.mxu1 %v916_v42  ;;  %1773 = vmatprep.subr.mxu0 %v2345_v56 }
 0x28d   :  { %1806 = vmatprep.subr.mxu1 %v2345_v56  ;;  %1774 = vmatpush3.msra.mxu0 %v930_v49  ;;  %v1293_v49 = vld [vmem:[#allocation20 + $0x68] sm:$0xff] }
 0x28e   :  { %1807 = vmatpush3.msra.mxu1 %v915_v44  ;;  %1775 = vmatprep.subr.mxu0 %v2345_v56 }
 0x28f   :  { %1808 = vmatprep.subr.mxu1 %v2345_v56  ;;  %1776 = vmatpush3.msra.mxu0 %v929_v51  ;;  %v1291_v51 = vld [vmem:[#allocation20 + $0x58] sm:$0xff] }
 0x290   :  { %1809 = vmatpush3.msra.mxu1 %v914_v46  ;;  %1777 = vmatprep.subr.mxu0 %v2345_v56  ;;  %v1184_v46 = vld [vmem:[#allocation18] sm:$0xff] }
 0x291   :  { %1810 = vmatprep.subr.mxu1 %v2345_v56  ;;  %1778 = vmatpush3.msra.mxu0 %v928_v53  ;;  %v1289_v53 = vld [vmem:[#allocation20 + $0x48] sm:$0xff] }
 0x292   :  { %1811 = vmatpush3.msra.mxu1 %v913_v48  ;;  %1779 = vmatprep.subr.mxu0 %v2345_v56  ;;  %v1294_v48 = vld [vmem:[#allocation20 + $0x70] sm:$0xff] }
 0x293   :  { %1812 = vmatprep.subr.mxu1 %v2345_v56  ;;  %1780 = vmatpush3.msra.mxu0 %v927_v55  ;;  %v1287_v55 = vld [vmem:[#allocation20 + $0x38] sm:$0xff] }
 0x294   :  { %1813 = vmatpush3.msra.mxu1 %v912_v50  ;;  %1781 = vmatprep.subr.mxu0 %v2345_v56  ;;  %v1292_v50 = vld [vmem:[#allocation20 + $0x60] sm:$0xff] }
 0x295   :  { %1814 = vmatprep.subr.mxu1 %v2345_v56  ;;  %1782 = vmatpush3.msra.mxu0 %v926_v58  ;;  %v1285_v58 = vld [vmem:[#allocation20 + $0x28] sm:$0xff] }
 0x296   :  { %1815 = vmatpush3.msra.mxu1 %v911_v52  ;;  %1783 = vmatprep.subr.mxu0 %v2345_v56  ;;  %v1290_v52 = vld [vmem:[#allocation20 + $0x50] sm:$0xff] }
 0x297   :  { %1816 = vmatprep.subr.mxu1 %v2345_v56  ;;  %1784 = vmatpush3.msra.mxu0 %v925_v60  ;;  %v1283_v60 = vld [vmem:[#allocation20 + $0x18] sm:$0xff] }
 0x298   :  { %1817 = vmatpush3.msra.mxu1 %v910_v54  ;;  %1785 = vmatprep.subr.mxu0 %v2345_v56  ;;  %v1288_v54 = vld [vmem:[#allocation20 + $0x40] sm:$0xff] }
 0x299   :  { %1818 = vmatprep.subr.mxu1 %v2345_v56  ;;  %1786 = vmatpush3.msra.mxu0 %v924_v61  ;;  %v1544_v61 = vld [vmem:[%s2708_s9] ss:$0 sm:$0xff] }
 0x29a   :  { %1819 = vmatpush3.msra.mxu1 %v909_v57  ;;  %1825 = vmatprep.subr.mxu0 %v2345_v56  ;;  %v1286_v57 = vld [vmem:[#allocation20 + $0x30] sm:$0xff] }
 0x29b   :  { %1820 = vmatprep.subr.mxu1 %v2345_v56 }
 0x29c   :  { %1821 = vmatpush3.msra.mxu1 %v908_v59  ;;  %v1284_v59 = vld [vmem:[#allocation20 + $0x20] sm:$0xff] }
 0x29d   :  { %1860 = vmatprep.subr.mxu1 %v2345_v56 }
 0x339   :  { %v800_v31 = vpop.f32.mrf.mxu0 }
 0x33a   :  { %v2576_v32 = vadd.f32 %v1542_v30, %v800_v31  ;;  %v1190_v31 = vld [vmem:[#allocation18 + $0x30] sm:$0xff] }
 0x33b   :  { %v1719_v33 = vpop.f32.mrf.mxu0 }
 0x33c   :  { %v804_v34 = vmul.f32 %v2576_v32, %v2576_v32  ;;  %v1188_v33 = vld [vmem:[#allocation18 + $0x20] sm:$0xff] }
 0x33d   :  { %v896_v35 = vpop.f32.mrf.mxu1 }
 0x33e   :  { %v2580_v36 = vadd.f32 %v1542_v30, %v896_v35  ;;  %v805_v37 = vsel %vm693_vm1, %v804_v34, 0.0  ;;  %v1191_v30 = vld [vmem:[#allocation18 + $0x38] sm:$0xff]  ;;  %v1186_v35 = vld [vmem:[#allocation18 + $0x10] sm:$0xff] }
 0x33f   :  { %806 = vadd.xlane.f32.xlu0 %v805_v37  ;;  %v1754_v38 = vpop.f32.mrf.mxu1  ;;  %v1187_v34 = vld [vmem:[#allocation18 + $0x18] sm:$0xff] }
 0x340   :  { %v900_v39 = vmul.f32 %v2580_v36, %v2580_v36 }
 0x342   :  { %v901_v40 = vsel %vm693_vm1, %v900_v39, 0.0  ;;  %v1543_v39 = vld [vmem:[%s2706_s7] ss:$0 sm:$0xff] }
 0x343   :  { %902 = vadd.xlane.f32.xlu1 %v901_v40 }
 0x3c8   :  { %v807_v62 = vpop.xlane.xlu0 %806 }
 0x3c9   :  { %v808_v63 = vadd.f32 1e-12, %v807_v62 }
 0x3cb   :  { %2067 = vrsqrt.f32 %v808_v63 }
 0x3cc   :  { %v903_v0 = vpop.xlane.xlu1 %902 }
 0x3cd   :  { %v904_v1 = vadd.f32 1e-12, %v903_v0 }
 0x3cf   :  { %2069 = vrsqrt.f32 %v904_v1  ;;  %v1282_v1 = vld [vmem:[#allocation20 + $0x10] sm:$0xff] }
 0x3d8   :  { %v2068_v2 = vpop.eup %2067 }
 0x3d9   :  { %v810_v3 = vmul.f32 %v2068_v2, %v2576_v32  ;;  %v1189_v32 = vld [vmem:[#allocation18 + $0x28] sm:$0xff] }
 0x3da   :  { %v1281_v2 = vld [vmem:[#allocation20 + $0x8] sm:$0xff] }
 0x3db   :  { %1823 = vmatmul.mubr.f32.vlgmr.msra.gmra.mxu1 %v810_v3  ;;  %907 = vst [vmem:[#allocation23] sm:$0x3] %v810_v3  ;;  %v1280_v3 = vld [vmem:[#allocation20] sm:$0xff] }
 0x3dc   :  { %v2070_v4 = vpop.eup %2069  ;;  %1892 = vmatprep.mubr.msk.f32.mxu1 %vm2346_vm2, %v2345_v56  ;;  %1861 = vmatpush3.msra.mxu1 %v1199_v22 }
 0x3dd   :  { %v906_v5 = vmul.f32 %v2070_v4, %v2580_v36  ;;  %1862 = vmatprep.subr.mxu1 %v2345_v56  ;;  %v1391_v4 = vld [vmem:[#allocation21 + $0x78] sm:$0xff] }
 0x3de   :  { %1863 = vmatpush3.msra.mxu1 %v1198_v23  ;;  %v1378_v23 = vld [vmem:[#allocation21 + $0x10] sm:$0xff] }
 0x3df   :  { %1788 = vmatmul.mubr.f32.vlgmr.msra.gmra.mxu0 %v906_v5  ;;  %1864 = vmatprep.subr.mxu1 %v2345_v56  ;;  %v1390_v5 = vld [vmem:[#allocation21 + $0x70] sm:$0xff] }
 0x3e0   :  { %1826 = vmatpush3.msra.mxu0 %v1106_v6  ;;  %1857 = vmatprep.mubr.msk.f32.mxu0 %vm2346_vm2, %v2345_v56  ;;  %v1389_v6 = vld [vmem:[#allocation21 + $0x68] sm:$0xff] }
 0x3e1   :  { %1827 = vmatprep.subr.mxu0 %v2345_v56  ;;  %1865 = vmatpush3.msra.mxu1 %v1197_v24  ;;  %v1377_v24 = vld [vmem:[#allocation21 + $0x8] sm:$0xff] }
 0x3e2   :  { %1828 = vmatpush3.msra.mxu0 %v1105_v7  ;;  %1866 = vmatprep.subr.mxu1 %v2345_v56  ;;  %v1388_v7 = vld [vmem:[#allocation21 + $0x60] sm:$0xff] }
 0x3e3   :  { %1829 = vmatprep.subr.mxu0 %v2345_v56  ;;  %1867 = vmatpush3.msra.mxu1 %v1196_v25  ;;  %v1376_v25 = vld [vmem:[#allocation21] sm:$0xff] }
 0x3e4   :  { %1830 = vmatpush3.msra.mxu0 %v1104_v8  ;;  %1868 = vmatprep.subr.mxu1 %v2345_v56  ;;  %v1387_v8 = vld [vmem:[#allocation21 + $0x58] sm:$0xff] }
 0x3e5   :  { %1831 = vmatprep.subr.mxu0 %v2345_v56  ;;  %1869 = vmatpush3.msra.mxu1 %v1195_v26  ;;  %v1546_v26 = vld [vmem:[%s2712_s13] ss:$0 sm:$0xff] }
 0x3e6   :  { %1832 = vmatpush3.msra.mxu0 %v1103_v9  ;;  %1870 = vmatprep.subr.mxu1 %v2345_v56  ;;  %v1386_v9 = vld [vmem:[#allocation21 + $0x50] sm:$0xff] }
 0x3e7   :  { %1833 = vmatprep.subr.mxu0 %v2345_v56  ;;  %1871 = vmatpush3.msra.mxu1 %v1194_v27 }
 0x3e8   :  { %1834 = vmatpush3.msra.mxu0 %v1102_v10  ;;  %1872 = vmatprep.subr.mxu1 %v2345_v56  ;;  %v1385_v10 = vld [vmem:[#allocation21 + $0x48] sm:$0xff] }
 0x3e9   :  { %1835 = vmatprep.subr.mxu0 %v2345_v56  ;;  %1873 = vmatpush3.msra.mxu1 %v1193_v28 }
 0x3ea   :  { %1836 = vmatpush3.msra.mxu0 %v1101_v11  ;;  %1874 = vmatprep.subr.mxu1 %v2345_v56  ;;  %v1384_v11 = vld [vmem:[#allocation21 + $0x40] sm:$0xff] }
 0x3eb   :  { %1837 = vmatprep.subr.mxu0 %v2345_v56  ;;  %1875 = vmatpush3.msra.mxu1 %v1192_v29 }
 0x3ec   :  { %1838 = vmatpush3.msra.mxu0 %v1100_v12  ;;  %1876 = vmatprep.subr.mxu1 %v2345_v56  ;;  %v1383_v12 = vld [vmem:[#allocation21 + $0x38] sm:$0xff] }
 0x3ed   :  { %1839 = vmatprep.subr.mxu0 %v2345_v56  ;;  %1877 = vmatpush3.msra.mxu1 %v1191_v30 }
 0x3ee   :  { %1840 = vmatpush3.msra.mxu0 %v1099_v13  ;;  %1878 = vmatprep.subr.mxu1 %v2345_v56  ;;  %v1382_v13 = vld [vmem:[#allocation21 + $0x30] sm:$0xff] }
 0x3ef   :  { %1841 = vmatprep.subr.mxu0 %v2345_v56  ;;  %1879 = vmatpush3.msra.mxu1 %v1190_v31 }
 0x3f0   :  { %1842 = vmatpush3.msra.mxu0 %v1098_v14  ;;  %1880 = vmatprep.subr.mxu1 %v2345_v56  ;;  %v1381_v14 = vld [vmem:[#allocation21 + $0x28] sm:$0xff] }
 0x3f1   :  { %1843 = vmatprep.subr.mxu0 %v2345_v56  ;;  %1881 = vmatpush3.msra.mxu1 %v1189_v32 }
 0x3f2   :  { %1844 = vmatpush3.msra.mxu0 %v1097_v15  ;;  %1882 = vmatprep.subr.mxu1 %v2345_v56  ;;  %v1380_v15 = vld [vmem:[#allocation21 + $0x20] sm:$0xff] }
 0x3f3   :  { %1845 = vmatprep.subr.mxu0 %v2345_v56  ;;  %1883 = vmatpush3.msra.mxu1 %v1188_v33 }
 0x3f4   :  { %1846 = vmatpush3.msra.mxu0 %v1096_v16  ;;  %1884 = vmatprep.subr.mxu1 %v2345_v56  ;;  %v1379_v16 = vld [vmem:[#allocation21 + $0x18] sm:$0xff] }
 0x3f5   :  { %1847 = vmatprep.subr.mxu0 %v2345_v56  ;;  %1885 = vmatpush3.msra.mxu1 %v1187_v34 }
 0x3f6   :  { %1848 = vmatpush3.msra.mxu0 %v1095_v17  ;;  %1886 = vmatprep.subr.mxu1 %v2345_v56  ;;  %v1545_v17 = vld [vmem:[%s2710_s11] ss:$0 sm:$0xff]  ;;  %s2347_s11 = smov [#allocation23]  }
 0x3f7   :  { %1849 = vmatprep.subr.mxu0 %v2345_v56  ;;  %1887 = vmatpush3.msra.mxu1 %v1186_v35  ;;  %s1482_s3 = sshll.u32 %s2347_s11, 4  ;;  %s1483_s3 = int_to_ptr.vmem [resolvable:$true] %s1482_s3 }
 0x3f8   :  { %1850 = vmatpush3.msra.mxu0 %v1094_v18  ;;  %1888 = vmatprep.subr.mxu1 %v2345_v56  ;;  %s2275_s21 = scalar_lea.vmem %s1483_s3, 32  ;;  %p2280_p9 = scmp.lt.s32.totalorder %s1483_s3, %s1483_s3 }
 0x3f9   :  { %1851 = vmatprep.subr.mxu0 %v2345_v56  ;;  %1889 = vmatpush3.msra.mxu1 %v1185_v45  ;;  %p2276_p8 = scmp.ne.s32.totalorder %s1483_s3, %s2275_s21  ;;  %p2281_p10 = scmp.lt.s32.totalorder %s2275_s21, %s2275_s21 }
 0x3fa   :  { %1852 = vmatpush3.msra.mxu0 %v1093_v19  ;;  %1890 = vmatprep.subr.mxu1 %v2345_v56 }
 0x3fb   :  { %1853 = vmatprep.subr.mxu0 %v2345_v56  ;;  %1891 = vmatpush3.msra.mxu1 %v1184_v46  ;;  %p2282_p11 = por %p2281_p10, %p2280_p9 }
 0x3fc   :  { %1854 = vmatpush3.msra.mxu0 %v1092_v20  ;;  %1930 = vmatprep.subr.mxu1 %v2345_v56 }
 0x3fd   :  { %1855 = vmatprep.subr.mxu0 %v2345_v56  ;;  %p2283_p12 = pnand %p2282_p11, %p2276_p8 }
 0x3fe   :  { %1856 = vmatpush3.msra.mxu0 %v1091_v21 }
 0x3ff   :  { %1895 = vmatprep.subr.mxu0 %v2345_v56 }
 0x49b   :  { %v1076_v36 = vpop.f32.mrf.mxu1 }
 0x49d   :  { %v1824_v37 = vpop.f32.mrf.mxu1 }
 0x49f   :  { %v1006_v38 = vpop.f32.mrf.mxu0 }
 0x4a0   :  { %v1077_v40 = vadd.f32 %v1076_v36, %v1006_v38 }
 0x4a1   :  { %v1789_v41 = vpop.f32.mrf.mxu0 }
 0x4a2   :  { %v1087_v42 = vadd.f32 %v1543_v39, %v1077_v40 }
 0x4a4   :  { %v1089_v43 = vmul.f32 0.02, %v1087_v42  ;;  %vm1088_vm3 = vcmp.gt.f32.partialorder %v1087_v42, 0.0 }
 0x4a6   :  { %v1090_v44 = vsel %vm1088_vm3, %v1087_v42, %v1089_v43 }
 0x4a7   :  { %1858 = vmatmul.mubr.f32.vlgmr.msra.gmra.mxu0 %v1090_v44 }
 0x4a8   :  { %1927 = vmatprep.mubr.msk.f32.mxu0 %vm2346_vm2, %v2345_v56  ;;  %1896 = vmatpush3.msra.mxu0 %v1295_v47 }
 0x4a9   :  { %1897 = vmatprep.subr.mxu0 %v2345_v56 }
 0x4aa   :  { %1898 = vmatpush3.msra.mxu0 %v1294_v48 }
 0x4ab   :  { %1899 = vmatprep.subr.mxu0 %v2345_v56 }
 0x4ac   :  { %1900 = vmatpush3.msra.mxu0 %v1293_v49 }
 0x4ad   :  { %1901 = vmatprep.subr.mxu0 %v2345_v56 }
 0x4ae   :  { %1902 = vmatpush3.msra.mxu0 %v1292_v50 }
 0x4af   :  { %1903 = vmatprep.subr.mxu0 %v2345_v56 }
 0x4b0   :  { %1904 = vmatpush3.msra.mxu0 %v1291_v51 }
 0x4b1   :  { %1905 = vmatprep.subr.mxu0 %v2345_v56 }
 0x4b2   :  { %1906 = vmatpush3.msra.mxu0 %v1290_v52 }
 0x4b3   :  { %1907 = vmatprep.subr.mxu0 %v2345_v56 }
 0x4b4   :  { %1908 = vmatpush3.msra.mxu0 %v1289_v53 }
 0x4b5   :  { %1909 = vmatprep.subr.mxu0 %v2345_v56 }
 0x4b6   :  { %1910 = vmatpush3.msra.mxu0 %v1288_v54 }
 0x4b7   :  { %1911 = vmatprep.subr.mxu0 %v2345_v56 }
 0x4b8   :  { %1912 = vmatpush3.msra.mxu0 %v1287_v55 }
 0x4b9   :  { %1913 = vmatprep.subr.mxu0 %v2345_v56 }
 0x4ba   :  { %1914 = vmatpush3.msra.mxu0 %v1286_v57 }
 0x4bb   :  { %1915 = vmatprep.subr.mxu0 %v2345_v56 }
 0x4bc   :  { %1916 = vmatpush3.msra.mxu0 %v1285_v58 }
 0x4bd   :  { %1917 = vmatprep.subr.mxu0 %v2345_v56 }
 0x4be   :  { %1918 = vmatpush3.msra.mxu0 %v1284_v59 }
 0x4bf   :  { %1919 = vmatprep.subr.mxu0 %v2345_v56 }
 0x4c0   :  { %1920 = vmatpush3.msra.mxu0 %v1283_v60 }
 0x4c1   :  { %1921 = vmatprep.subr.mxu0 %v2345_v56 }
 0x4c2   :  { %1922 = vmatpush3.msra.mxu0 %v1282_v1 }
 0x4c3   :  { %1923 = vmatprep.subr.mxu0 %v2345_v56 }
 0x4c4   :  { %1924 = vmatpush3.msra.mxu0 %v1281_v2 }
 0x4c5   :  { %1925 = vmatprep.subr.mxu0 %v2345_v56 }
 0x4c6   :  { %1926 = vmatpush3.msra.mxu0 %v1280_v3 }
 0x567   :  { %v1180_v62 = vpop.f32.mrf.mxu0 }
 0x568   :  { %v1181_v63 = vadd.f32 %v1544_v61, %v1180_v62 }
 0x569   :  { %v1859_v0 = vpop.f32.mrf.mxu0 }
 0x56a   :  { %1893 = vmatmul.mubr.f32.vlgmr.msra.gmra.mxu1 %v1181_v63 }
 0x56b   :  { %1962 = vmatprep.mubr.msk.f32.mxu1 %vm2346_vm2, %v2345_v56  ;;  %1931 = vmatpush3.msra.mxu1 %v1391_v4 }
 0x56c   :  { %1932 = vmatprep.subr.mxu1 %v2345_v56 }
 0x56d   :  { %1933 = vmatpush3.msra.mxu1 %v1390_v5 }
 0x56e   :  { %1934 = vmatprep.subr.mxu1 %v2345_v56 }
 0x56f   :  { %1935 = vmatpush3.msra.mxu1 %v1389_v6 }
 0x570   :  { %1936 = vmatprep.subr.mxu1 %v2345_v56 }
 0x571   :  { %1937 = vmatpush3.msra.mxu1 %v1388_v7 }
 0x572   :  { %1938 = vmatprep.subr.mxu1 %v2345_v56 }
 0x573   :  { %1939 = vmatpush3.msra.mxu1 %v1387_v8 }
 0x574   :  { %1940 = vmatprep.subr.mxu1 %v2345_v56 }
 0x575   :  { %1941 = vmatpush3.msra.mxu1 %v1386_v9 }
 0x576   :  { %1942 = vmatprep.subr.mxu1 %v2345_v56 }
 0x577   :  { %1943 = vmatpush3.msra.mxu1 %v1385_v10 }
 0x578   :  { %1944 = vmatprep.subr.mxu1 %v2345_v56 }
 0x579   :  { %1945 = vmatpush3.msra.mxu1 %v1384_v11 }
 0x57a   :  { %1946 = vmatprep.subr.mxu1 %v2345_v56 }
 0x57b   :  { %1947 = vmatpush3.msra.mxu1 %v1383_v12 }
 0x57c   :  { %1948 = vmatprep.subr.mxu1 %v2345_v56 }
 0x57d   :  { %1949 = vmatpush3.msra.mxu1 %v1382_v13 }
 0x57e   :  { %1950 = vmatprep.subr.mxu1 %v2345_v56 }
 0x57f   :  { %1951 = vmatpush3.msra.mxu1 %v1381_v14 }
 0x580   :  { %1952 = vmatprep.subr.mxu1 %v2345_v56 }
 0x581   :  { %1953 = vmatpush3.msra.mxu1 %v1380_v15 }
 0x582   :  { %1954 = vmatprep.subr.mxu1 %v2345_v56 }
 0x583   :  { %1955 = vmatpush3.msra.mxu1 %v1379_v16 }
 0x584   :  { %1956 = vmatprep.subr.mxu1 %v2345_v56 }
 0x585   :  { %1957 = vmatpush3.msra.mxu1 %v1378_v23 }
 0x586   :  { %1958 = vmatprep.subr.mxu1 %v2345_v56 }
 0x587   :  { %1959 = vmatpush3.msra.mxu1 %v1377_v24 }
 0x588   :  { %1960 = vmatprep.subr.mxu1 %v2345_v56 }
 0x589   :  { %1961 = vmatpush3.msra.mxu1 %v1376_v25 }
 0x62a   :  { %v1273_v18 = vpop.f32.mrf.mxu1 }
 0x62b   :  { %v1274_v19 = vadd.f32 %v1545_v17, %v1273_v18 }
 0x62c   :  { %v1894_v20 = vpop.f32.mrf.mxu1 }
 0x62d   :  { %vm1277_vm4 = vcmp.gt.f32.partialorder %v1274_v19, 0.0  ;;  %v1278_v21 = vmul.f32 0.02, %v1274_v19 }
 0x62f   :  { %v1279_v22 = vsel %vm1277_vm4, %v1274_v19, %v1278_v21 }
 0x630   :  { %1928 = vmatmul.mubr.f32.vlgmr.msra.gmra.mxu0 %v1279_v22 }
 0x6f0   :  { %v1369_v27 = vpop.f32.mrf.mxu0 }
 0x6f1   :  { %v1370_v28 = vadd.f32 %v1546_v26, %v1369_v27 }
 0x6f2   :  { %v1929_v29 = vpop.f32.mrf.mxu0 }
 0x6f3   :  { %vm1373_vm5 = vcmp.gt.f32.partialorder %v1370_v28, 0.0  ;;  %v1374_v30 = vmul.f32 0.02, %v1370_v28 }
 0x6f5   :  { %v1375_v31 = vsel %vm1373_vm5, %v1370_v28, %v1374_v30 }
 0x6f6   :  { %1963 = vmatmul.mubr.f32.vlgmr.msra.gmra.mxu1 %v1375_v31 }
 0x6f7   :  { %2286 = shalt.err (!%p2283_p12)
}
 0x6f8   :  { %1485 = dma.vmem_to_hbm [thread:$0]  %s1483_s3, 32, %s2715_s16, [#allocation8]   ;;  %v1547_v56 = vld [vmem:[%s2714_s15] ss:$0 sm:$0xff] }
 0x6f9   :  { %s2348_s20 = smov [#allocation24]  }
 0x6fa   :  { %s1492_s26 = sshll.u32 %s2348_s20, 4  ;;  %s1493_s26 = int_to_ptr.vmem [resolvable:$true] %s1492_s26 }
 0x6fb   :  { %s2295_s25 = scalar_lea.vmem %s1493_s26, 32  ;;  %p2300_p0 = scmp.lt.s32.totalorder %s1493_s26, %s1493_s26 }
 0x6fc   :  { %p2296_p13 = scmp.ne.s32.totalorder %s1493_s26, %s2295_s25  ;;  %p2301_p1 = scmp.lt.s32.totalorder %s2295_s25, %s2295_s25 }
 0x6fe   :  { %p2302_p2 = por %p2301_p1, %p2300_p0 }
 0x700   :  { %p2303_p3 = pnand %p2302_p2, %p2296_p13 }
 0x7b6   :  { %v1465_v32 = vpop.f32.mrf.mxu1 }
 0x7b7   :  { %v1466_v33 = vadd.f32 %v1547_v56, %v1465_v32 }
 0x7b8   :  { %v1964_v34 = vpop.f32.mrf.mxu1 }
 0x7b9   :  { %v1548_v35 = vmul.f32 -1.442695, %v1466_v33 }
 0x7bb   :  { %2071 = vpow2.f32 %v1548_v35 }
 0x7c8   :  { %v2072_v36 = vpop.eup %2071 }
 0x7c9   :  { %v1472_v37 = vadd.f32 1.0, %v2072_v36 }
 0x7cb   :  { %2073 = vrcp.f32 %v1472_v37 }
 0x7d8   :  { %v2074_v38 = vpop.eup %2073 }
 0x7d9   :  { %1475 = vst [vmem:[#allocation24] sm:$0x3] %v2074_v38 }
 0x7da   :  { %2306 = shalt.err (!%p2303_p3)
}
 0x7db   :  { %1495 = dma.vmem_to_hbm [thread:$0]  %s1493_s26, 32, %s2716_s17, [#allocation25]  }
 0x7dc   :  { %2327 = dma.done.wait [#allocation8], 32  }
 0x7dd   :  { %2328 = vsyncadd [#allocation8], 4294967264 }
 0x7de   :  { %2329 = dma.done.wait [#allocation25], 32  }
 0x7df   :  { %2330 = vsyncadd [#allocation25], 4294967264 }
 0x7e0   :  { %1502 = vsyncpa [#allocation7], 1 }
 0x7e1   :  { %1503 = vsyncpa [#allocation10], 1 }
 0x7e2   :  { %1504 = vsyncpa [#allocation13], 1 }
 0x7e3   :  { %1505 = vsyncpa [#allocation16], 1 }
 0x7e4   :  { %1506 = vsyncpa [#allocation19], 1 }
 0x7e5   :  { %1507 = vsyncpa [#allocation22], 1 }
 0x7e6   :  { %1508 = vsyncpa [#allocation8], 1 }
 0x7e7   :  { %1509 = vsyncpa [#allocation25], 1 }

</bundles_post_ra>
